<compile_context>
chip_gen: v7x
topology: tpu7x:2x2x1
jax: 0.10.0
libtpu: 0.0.40
codegen_flags: <defaults>
</compile_context>

<pallas_src>
import functools

import jax
import jax.numpy as jnp
from jax.experimental import pallas as pl
from jax.experimental.pallas import tpu as pltpu


def _round_up(x, m):
    return ((x + m - 1) // m) * m


def _cdiv(a, b):
    return (a + b - 1) // b


def _is_v7x():
    """Only v7x has 2 TensorCores per Pallas device; gate multi-core tuning on it."""
    try:
        kind = (jax.devices()[0].device_kind or "").lower()
        return "v7" in kind
    except Exception:
        return False


def _vmem_tile_bytes(shape, dtype):
    """Approximate (sublane, lane)-padded VMEM footprint of a 2-D tile."""
    r, c = int(shape[0]), int(shape[1])
    return _round_up(r, 16) * _round_up(c, 128) * jnp.dtype(dtype).itemsize


def _value_critic_kernel(n_hidden, matmul_dtype, x_ref, *refs):
    """Fused MLP forward for one batch tile.

    x_ref     : (tile_b, in_dim)            batch-major state tile (original dtype)
    refs[:n]  : W_l (hid_pad, d_in)         matmul-dtype weights, native [out, in] orientation
    refs[n]   : (hid_pad, n_hidden + 1) f32 packed [b_0 | ... | b_{n-1} | w_last] columns
    refs[n+1] : (1, 1) f32                  final bias
    refs[-1]  : (1, tile_b) f32             lane-dense value row (output)
    """
    out_ref = refs[-1]
    w_refs = refs[:n_hidden]
    b_all_ref = refs[n_hidden]
    b_last_ref = refs[n_hidden + 1]

    # Layer 0: contract W0 [hid, in] with batch-major x [tile_b, in] on the MXU
    # (q @ k^T style contraction) -> feature-major activations (hid_pad, tile_b), f32 acc.
    x = x_ref[...].astype(matmul_dtype)
    h = jax.lax.dot_general(
        w_refs[0][...], x,
        dimension_numbers=(((1,), (1,)), ((), ())),
        preferred_element_type=jnp.float32)
    h = jnp.maximum(h + b_all_ref[:, 0:1], 0.0)        # bias add + ReLU in f32 (VPU)

    # Hidden layers: W_l @ h on the MXU, f32 accumulate.
    for l in range(1, n_hidden):
        y = jnp.dot(w_refs[l][...], h.astype(matmul_dtype),
                    preferred_element_type=jnp.float32)
        h = jnp.maximum(y + b_all_ref[:, l:l + 1], 0.0)

    # Final Linear(hidden, 1): VPU multiply + sublane (XLU) reduction -> lane-dense row.
    w_last = b_all_ref[:, n_hidden:n_hidden + 1]        # (hid_pad, 1) f32
    v = jnp.sum(h * w_last, axis=0, keepdims=True) + b_last_ref[...]
    out_ref[...] = v.astype(out_ref.dtype)


def value_critic_forward(state, params, *, matmul_dtype=jnp.bfloat16,
                         tile_b=None, max_tile=1024):
    """Forward pass of ValueCritic.

    state : [B, in_dim]
    params: list of (W, b) in PyTorch Linear orientation: W [d_out, d_in], b [d_out]
            (n_layers ReLU'd hidden Linears, then a final (1, hidden) Linear).
    Returns [B, 1] in state.dtype.
    """
    B, in_dim = state.shape
    n_linear = len(params)
    n_hidden = n_linear - 1
    assert n_hidden >= 1, "need at least one hidden layer"
    hidden_dim = params[0][0].shape[0]
    assert params[-1][0].shape == (1, hidden_dim), "final layer must be (1, hidden_dim)"

    matmul_dtype = jnp.dtype(matmul_dtype)
    hid_pad = _round_up(hidden_dim, 128)   # lane-aligned hidden width (exact: zero padding)

    # ---- batch tiling ---------------------------------------------------------
    is_v7x = _is_v7x()
    num_cores = 2 if is_v7x else 1
    if tile_b is None:
        if num_cores > 1 and B >= 2 * 128:
            # Give each v7x TensorCore at least one tile (256-aligned for the 256-wide MXU).
            tile_b = min(max(256, _round_up(max_tile, 256)),
                         _round_up(_cdiv(B, num_cores), 256))
        elif B <= max_tile:
            tile_b = B                      # single fat tile on single-TC chips
        else:
            tile_b = max(128, _round_up(max_tile, 128))
    tile_b = int(tile_b)
    if tile_b >= B:
        tile_b = _round_up(B, 8)            # single grid step; blocks equal full arrays
    else:
        tile_b = max(128, _round_up(tile_b, 128))  # lane-dense output needs 128-mult tiles
    B_pad = _round_up(B, tile_b)
    grid = B_pad // tile_b

    # ---- operands (state untouched except optional batch zero-pad) ------------
    x_in = state if B_pad == B else jnp.pad(state, ((0, B_pad - B), (0, 0)))

    weights = []
    b_cols = []
    for l in range(n_hidden):
        W, b = params[l]
        d_out, d_in = W.shape
        d_in_p = in_dim if l == 0 else hid_pad      # no feature padding on the input layer
        Wp = jnp.pad(W, ((0, hid_pad - d_out), (0, d_in_p - d_in))).astype(matmul_dtype)
        weights.append(Wp)
        b_cols.append(jnp.pad(b.astype(jnp.float32), (0, hid_pad - d_out)))
    W_last, b_last = params[-1]
    b_cols.append(jnp.pad(W_last.astype(jnp.float32).reshape(-1),
                          (0, hid_pad - hidden_dim)))
    b_all = jnp.stack(b_cols, axis=1)               # (hid_pad, n_hidden + 1) f32
    b_last_sc = jnp.asarray(b_last, jnp.float32).reshape(1, 1)
    const_ops = weights + [b_all, b_last_sc]        # grid-invariant, VMEM-resident

    # ---- specs ----------------------------------------------------------------
    x_spec = pl.BlockSpec((tile_b, in_dim), lambda i: (i, 0))
    out_spec = pl.BlockSpec((1, tile_b), lambda i: (0, i))   # lane-dense output row

    def _const_specs(use_buffered):
        specs = []
        for p in const_ops:
            if use_buffered:
                # Constant index_map => never re-DMA'd; single-buffer to halve VMEM.
                specs.append(pl.BlockSpec(p.shape, lambda i: (0, 0),
                                          pipeline_mode=pl.Buffered(1)))
            else:
                specs.append(pl.BlockSpec(p.shape, lambda i: (0, 0)))
        return specs

    # ---- VMEM budget / cost estimate ------------------------------------------
    state_itemsize = jnp.dtype(state.dtype).itemsize
    const_bytes = sum(_vmem_tile_bytes(p.shape, p.dtype) for p in const_ops)
    x_tile_bytes = 2 * _vmem_tile_bytes((tile_b, in_dim), state.dtype)
    out_tile_bytes = 2 * _vmem_tile_bytes((1, tile_b), jnp.float32)
    act_bytes = 4 * _round_up(tile_b, 128) * hid_pad * 4     # live f32 intermediates
    needed = const_bytes + x_tile_bytes + out_tile_bytes + act_bytes
    vmem_limit = int(min(max(needed + needed // 2 + (4 << 20), 32 << 20), 64 << 20))

    flops = (2 * B_pad * hid_pad * in_dim
             + (n_hidden - 1) * 2 * B_pad * hid_pad * hid_pad
             + 2 * B_pad * hid_pad)
    bytes_accessed = (int(x_in.size) * state_itemsize
                      + sum(int(p.size) * p.dtype.itemsize for p in const_ops)
                      + B_pad * 4)

    if is_v7x and grid > 1:
        dim_sem = (pltpu.CORE_PARALLEL,)    # actually shard the batch grid over both TCs
    else:
        dim_sem = ("parallel",)

    kernel = functools.partial(_value_critic_kernel, n_hidden, matmul_dtype)

    def _run(use_buffered):
        return pl.pallas_call(
            kernel,
            out_shape=jax.ShapeDtypeStruct((1, B_pad), jnp.float32),
            grid_spec=pltpu.PrefetchScalarGridSpec(
                num_scalar_prefetch=0,
                grid=(grid,),
                in_specs=[x_spec] + _const_specs(use_buffered),
                out_specs=out_spec,
            ),
            compiler_params=pltpu.CompilerParams(
                dimension_semantics=dim_sem,
                vmem_limit_bytes=vmem_limit,
            ),
            cost_estimate=pl.CostEstimate(
                flops=int(flops), transcendentals=0,
                bytes_accessed=int(bytes_accessed)),
        )(x_in, *const_ops)

    try:
        out = _run(True)       # preferred: single-buffered invariant weights/biases
    except Exception:
        out = _run(False)      # robust fallback: default double-buffering

    return out[0, :B].reshape(B, 1).astype(state.dtype)


def init_value_critic_params(key, in_dim, hidden_dim, n_layers):
    """PyTorch-Linear-style init (uniform +/- 1/sqrt(fan_in)); native [out, in] weights."""
    dims = [in_dim] + [hidden_dim] * n_layers + [1]
    params = []
    for d_in, d_out in zip(dims[:-1], dims[1:]):
        key, kw, kb = jax.random.split(key, 3)
        bound = 1.0 / float(d_in) ** 0.5
        W = jax.random.uniform(kw, (d_out, d_in), jnp.float32, -bound, bound)
        b = jax.random.uniform(kb, (d_out,), jnp.float32, -bound, bound)
        params.append((W, b))
    return params


def _reference_forward(state, params, cast_dtype=None):
    """Plain-JAX reference MLP.  cast_dtype mimics the kernel's MXU-operand rounding."""
    h = state
    n = len(params)
    for l, (W, b) in enumerate(params):
        if cast_dtype is not None:
            h_m = h.astype(cast_dtype).astype(jnp.float32)
            W_m = W.astype(cast_dtype).astype(jnp.float32)
        else:
            h_m, W_m = h, W
        h = h_m @ W_m.T + b
        if l < n - 1:
            h = jnp.maximum(h, 0.0)
    return h


if __name__ == "__main__":
    key = jax.random.PRNGKey(0)

    # Small shapes consistent with ValueCritic(in_dim, hidden_dim, n_layers).
    batch, in_dim, hidden_dim, n_layers = 16, 16, 32, 2

    k_state, k_params = jax.random.split(key)
    state = jax.random.normal(k_state, (batch, in_dim), jnp.float32)
    params = init_value_critic_params(k_params, in_dim, hidden_dim, n_layers)

    ref = _reference_forward(state, params)

    # 1) Structural exactness check: f32 MXU operands must match the reference tightly
    #    (padding / fusion / layout must not change the math).
    out_f32 = jax.block_until_ready(
        value_critic_forward(state, params, matmul_dtype=jnp.float32))
    assert out_f32.shape == (batch, 1), out_f32.shape
    assert jnp.allclose(out_f32, ref, atol=1e-4, rtol=1e-4), "f32 kernel mismatch vs reference"

    # 2) Default path (bf16 MXU operands, f32 accumulate): mixed-precision tolerances.
    out_bf16 = jax.block_until_ready(value_critic_forward(state, params))
    ref_bf16 = _reference_forward(state, params, cast_dtype=jnp.bfloat16)
    assert out_bf16.shape == (batch, 1), out_bf16.shape
    assert jnp.allclose(out_bf16, ref_bf16, atol=5e-3, rtol=5e-3), \
        "bf16 kernel mismatch vs bf16-rounded reference"
    assert jnp.allclose(out_bf16, ref, atol=5e-2, rtol=5e-2), \
        "bf16 kernel drifted too far from f32 reference"

    print("KERNEL_OK")
</pallas_src>

<mosaic_0001>
module attributes {stable_mosaic.version = 11 : i64} {
  func.func @_value_critic_kernel(%arg0: i32, %arg1: memref<16x16xf32, #tpu.memory_space<vmem>>, %arg2: memref<128x16xf32, #tpu.memory_space<vmem>>, %arg3: memref<128x128xf32, #tpu.memory_space<vmem>>, %arg4: memref<128x3xf32, #tpu.memory_space<vmem>>, %arg5: memref<1x1xf32, #tpu.memory_space<vmem>>, %arg6: memref<1x16xf32, #tpu.memory_space<vmem>>) attributes {dimension_semantics = [#tpu.dimension_semantics<parallel>], iteration_bounds = array<i64: 1>, scalar_prefetch = 0 : i64, scratch_operands = 0 : i64, tpu.core_type = #tpu.core_type<tc>, window_params = [{transform_indices = @transform_0, window_bounds = array<i64: 16, 16>}, {pipeline_mode = #tpu.pipeline_mode<synchronous>, transform_indices = @transform_1, window_bounds = array<i64: 128, 16>}, {pipeline_mode = #tpu.pipeline_mode<synchronous>, transform_indices = @transform_2, window_bounds = array<i64: 128, 128>}, {pipeline_mode = #tpu.pipeline_mode<synchronous>, transform_indices = @transform_3, window_bounds = array<i64: 128, 3>}, {pipeline_mode = #tpu.pipeline_mode<synchronous>, transform_indices = @transform_4, window_bounds = array<i64: 1, 1>}, {transform_indices = @transform_5, window_bounds = array<i64: 1, 16>}]} {
    %c0 = arith.constant 0 : index
    %c0_0 = arith.constant 0 : index
    %0 = vector.load %arg1[%c0, %c0_0] : memref<16x16xf32, #tpu.memory_space<vmem>>, vector<16x16xf32>
    %c0_1 = arith.constant 0 : index
    %c0_2 = arith.constant 0 : index
    %1 = vector.load %arg2[%c0_1, %c0_2] : memref<128x16xf32, #tpu.memory_space<vmem>>, vector<128x16xf32>
    %cst = arith.constant dense<0.000000e+00> : vector<128x16xf32>
    %2 = tpu.matmul %1, %0, %cst {dimension_numbers = #tpu.dot_dimension_numbers<[1], [1], [0], [0], [0, 0, 1, 0], [], []>} : vector<128x16xf32>, vector<16x16xf32>, vector<128x16xf32> -> vector<128x16xf32>
    %c0_3 = arith.constant 0 : index
    %c0_4 = arith.constant 0 : index
    %3 = vector.load %arg4[%c0_3, %c0_4] : memref<128x3xf32, #tpu.memory_space<vmem>>, vector<128x1xf32>
    %4 = vector.broadcast %3 : vector<128x1xf32> to vector<128x16xf32>
    %5 = arith.addf %2, %4 : vector<128x16xf32>
    %cst_5 = arith.constant 0.000000e+00 : f32
    %6 = vector.broadcast %cst_5 : f32 to vector<128x16xf32>
    %7 = arith.maximumf %5, %6 : vector<128x16xf32>
    %c0_6 = arith.constant 0 : index
    %c0_7 = arith.constant 0 : index
    %8 = vector.load %arg3[%c0_6, %c0_7] : memref<128x128xf32, #tpu.memory_space<vmem>>, vector<128x128xf32>
    %cst_8 = arith.constant dense<0.000000e+00> : vector<128x16xf32>
    %9 = tpu.matmul %8, %7, %cst_8 {dimension_numbers = #tpu.dot_dimension_numbers<[1], [0], [0], [1], [0, 0, 1, 1], [], []>} : vector<128x128xf32>, vector<128x16xf32>, vector<128x16xf32> -> vector<128x16xf32>
    %c0_9 = arith.constant 0 : index
    %c1 = arith.constant 1 : index
    %10 = vector.load %arg4[%c0_9, %c1] : memref<128x3xf32, #tpu.memory_space<vmem>>, vector<128x1xf32>
    %11 = vector.broadcast %10 : vector<128x1xf32> to vector<128x16xf32>
    %12 = arith.addf %9, %11 : vector<128x16xf32>
    %cst_10 = arith.constant 0.000000e+00 : f32
    %13 = vector.broadcast %cst_10 : f32 to vector<128x16xf32>
    %14 = arith.maximumf %12, %13 : vector<128x16xf32>
    %c0_11 = arith.constant 0 : index
    %c2 = arith.constant 2 : index
    %15 = vector.load %arg4[%c0_11, %c2] : memref<128x3xf32, #tpu.memory_space<vmem>>, vector<128x1xf32>
    %16 = vector.broadcast %15 : vector<128x1xf32> to vector<128x16xf32>
    %17 = arith.mulf %14, %16 : vector<128x16xf32>
    %cst_12 = arith.constant dense<0.000000e+00> : vector<16xf32>
    %18 = vector.multi_reduction <add>, %17, %cst_12 [0] : vector<128x16xf32> to vector<16xf32>
    %19 = vector.shape_cast %18 : vector<16xf32> to vector<1x16xf32>
    %c0_13 = arith.constant 0 : index
    %c0_14 = arith.constant 0 : index
    %20 = vector.load %arg5[%c0_13, %c0_14] : memref<1x1xf32, #tpu.memory_space<vmem>>, vector<1x1xf32>
    %21 = vector.broadcast %20 : vector<1x1xf32> to vector<1x16xf32>
    %22 = arith.addf %19, %21 : vector<1x16xf32>
    %c0_15 = arith.constant 0 : index
    %c0_16 = arith.constant 0 : index
    %23 = vector.load %arg6[%c0_15, %c0_16] : memref<1x16xf32, #tpu.memory_space<vmem>>, vector<1x16xf32>
    tpu.vector_store %arg6[%c0_15, %c0_16], %22 {strides = array<i32>} : memref<1x16xf32, #tpu.memory_space<vmem>>, vector<1x16xf32>,
    return
  }
  func.func @transform_0(%arg0: i32) -> (i32, i32) {
    %c0_i32 = arith.constant 0 : i32
    %c0_i32_0 = arith.constant 0 : i32
    return %arg0, %c0_i32 : i32, i32
  }
  func.func @transform_1(%arg0: i32) -> (i32, i32) {
    %c0_i32 = arith.constant 0 : i32
    %c0_i32_0 = arith.constant 0 : i32
    %c0_i32_1 = arith.constant 0 : i32
    return %c0_i32, %c0_i32_0 : i32, i32
  }
  func.func @transform_2(%arg0: i32) -> (i32, i32) {
    %c0_i32 = arith.constant 0 : i32
    %c0_i32_0 = arith.constant 0 : i32
    %c0_i32_1 = arith.constant 0 : i32
    return %c0_i32, %c0_i32_0 : i32, i32
  }
  func.func @transform_3(%arg0: i32) -> (i32, i32) {
    %c0_i32 = arith.constant 0 : i32
    %c0_i32_0 = arith.constant 0 : i32
    %c0_i32_1 = arith.constant 0 : i32
    return %c0_i32, %c0_i32_0 : i32, i32
  }
  func.func @transform_4(%arg0: i32) -> (i32, i32) {
    %c0_i32 = arith.constant 0 : i32
    %c0_i32_0 = arith.constant 0 : i32
    %c0_i32_1 = arith.constant 0 : i32
    return %c0_i32, %c0_i32_0 : i32, i32
  }
  func.func @transform_5(%arg0: i32) -> (i32, i32) {
    %c0_i32 = arith.constant 0 : i32
    %c0_i32_0 = arith.constant 0 : i32
    return %c0_i32, %arg0 : i32, i32
  }
}

module attributes {stable_mosaic.version = 11 : i64} {
  func.func @_value_critic_kernel(%arg0: i32, %arg1: memref<16x16xf32, #tpu.memory_space<vmem>>, %arg2: memref<128x16xf32, #tpu.memory_space<vmem>>, %arg3: memref<128x128xf32, #tpu.memory_space<vmem>>, %arg4: memref<128x3xf32, #tpu.memory_space<vmem>>, %arg5: memref<1x1xf32, #tpu.memory_space<vmem>>, %arg6: memref<1x16xf32, #tpu.memory_space<vmem>>) attributes {dimension_semantics = [#tpu.dimension_semantics<parallel>], iteration_bounds = array<i64: 1>, scalar_prefetch = 0 : i64, scratch_operands = 0 : i64, tpu.core_type = #tpu.core_type<tc>, window_params = [{transform_indices = @transform_0, window_bounds = array<i64: 16, 16>}, {pipeline_mode = #tpu.pipeline_mode<synchronous>, transform_indices = @transform_1, window_bounds = array<i64: 128, 16>}, {pipeline_mode = #tpu.pipeline_mode<synchronous>, transform_indices = @transform_2, window_bounds = array<i64: 128, 128>}, {pipeline_mode = #tpu.pipeline_mode<synchronous>, transform_indices = @transform_3, window_bounds = array<i64: 128, 3>}, {pipeline_mode = #tpu.pipeline_mode<synchronous>, transform_indices = @transform_4, window_bounds = array<i64: 1, 1>}, {transform_indices = @transform_5, window_bounds = array<i64: 1, 16>}]} {
    %c0 = arith.constant 0 : index
    %c0_0 = arith.constant 0 : index
    %0 = vector.load %arg1[%c0, %c0_0] : memref<16x16xf32, #tpu.memory_space<vmem>>, vector<16x16xf32>
    %c0_1 = arith.constant 0 : index
    %c0_2 = arith.constant 0 : index
    %1 = vector.load %arg2[%c0_1, %c0_2] : memref<128x16xf32, #tpu.memory_space<vmem>>, vector<128x16xf32>
    %cst = arith.constant dense<0.000000e+00> : vector<128x16xf32>
    %2 = tpu.matmul %1, %0, %cst {dimension_numbers = #tpu.dot_dimension_numbers<[1], [1], [0], [0], [0, 0, 1, 0], [], []>} : vector<128x16xf32>, vector<16x16xf32>, vector<128x16xf32> -> vector<128x16xf32>
    %c0_3 = arith.constant 0 : index
    %c0_4 = arith.constant 0 : index
    %3 = vector.load %arg4[%c0_3, %c0_4] : memref<128x3xf32, #tpu.memory_space<vmem>>, vector<128x1xf32>
    %4 = vector.broadcast %3 : vector<128x1xf32> to vector<128x16xf32>
    %5 = arith.addf %2, %4 : vector<128x16xf32>
    %cst_5 = arith.constant 0.000000e+00 : f32
    %6 = vector.broadcast %cst_5 : f32 to vector<128x16xf32>
    %7 = arith.maximumf %5, %6 : vector<128x16xf32>
    %c0_6 = arith.constant 0 : index
    %c0_7 = arith.constant 0 : index
    %8 = vector.load %arg3[%c0_6, %c0_7] : memref<128x128xf32, #tpu.memory_space<vmem>>, vector<128x128xf32>
    %cst_8 = arith.constant dense<0.000000e+00> : vector<128x16xf32>
    %9 = tpu.matmul %8, %7, %cst_8 {dimension_numbers = #tpu.dot_dimension_numbers<[1], [0], [0], [1], [0, 0, 1, 1], [], []>} : vector<128x128xf32>, vector<128x16xf32>, vector<128x16xf32> -> vector<128x16xf32>
    %c0_9 = arith.constant 0 : index
    %c1 = arith.constant 1 : index
    %10 = vector.load %arg4[%c0_9, %c1] : memref<128x3xf32, #tpu.memory_space<vmem>>, vector<128x1xf32>
    %11 = vector.broadcast %10 : vector<128x1xf32> to vector<128x16xf32>
    %12 = arith.addf %9, %11 : vector<128x16xf32>
    %cst_10 = arith.constant 0.000000e+00 : f32
    %13 = vector.broadcast %cst_10 : f32 to vector<128x16xf32>
    %14 = arith.maximumf %12, %13 : vector<128x16xf32>
    %c0_11 = arith.constant 0 : index
    %c2 = arith.constant 2 : index
    %15 = vector.load %arg4[%c0_11, %c2] : memref<128x3xf32, #tpu.memory_space<vmem>>, vector<128x1xf32>
    %16 = vector.broadcast %15 : vector<128x1xf32> to vector<128x16xf32>
    %17 = arith.mulf %14, %16 : vector<128x16xf32>
    %cst_12 = arith.constant dense<0.000000e+00> : vector<16xf32>
    %18 = vector.multi_reduction <add>, %17, %cst_12 [0] : vector<128x16xf32> to vector<16xf32>
    %19 = vector.shape_cast %18 : vector<16xf32> to vector<1x16xf32>
    %c0_13 = arith.constant 0 : index
    %c0_14 = arith.constant 0 : index
    %20 = vector.load %arg5[%c0_13, %c0_14] : memref<1x1xf32, #tpu.memory_space<vmem>>, vector<1x1xf32>
    %21 = vector.broadcast %20 : vector<1x1xf32> to vector<1x16xf32>
    %22 = arith.addf %19, %21 : vector<1x16xf32>
    %c0_15 = arith.constant 0 : index
    %c0_16 = arith.constant 0 : index
    %23 = vector.load %arg6[%c0_15, %c0_16] : memref<1x16xf32, #tpu.memory_space<vmem>>, vector<1x16xf32>
    tpu.vector_store %arg6[%c0_15, %c0_16], %22 {strides = array<i32>} : memref<1x16xf32, #tpu.memory_space<vmem>>, vector<1x16xf32>,
    return
  }
  func.func @transform_0(%arg0: i32) -> (i32, i32) {
    %c0_i32 = arith.constant 0 : i32
    %c0_i32_0 = arith.constant 0 : i32
    return %arg0, %c0_i32 : i32, i32
  }
  func.func @transform_1(%arg0: i32) -> (i32, i32) {
    %c0_i32 = arith.constant 0 : i32
    %c0_i32_0 = arith.constant 0 : i32
    %c0_i32_1 = arith.constant 0 : i32
    return %c0_i32, %c0_i32_0 : i32, i32
  }
  func.func @transform_2(%arg0: i32) -> (i32, i32) {
    %c0_i32 = arith.constant 0 : i32
    %c0_i32_0 = arith.constant 0 : i32
    %c0_i32_1 = arith.constant 0 : i32
    return %c0_i32, %c0_i32_0 : i32, i32
  }
  func.func @transform_3(%arg0: i32) -> (i32, i32) {
    %c0_i32 = arith.constant 0 : i32
    %c0_i32_0 = arith.constant 0 : i32
    %c0_i32_1 = arith.constant 0 : i32
    return %c0_i32, %c0_i32_0 : i32, i32
  }
  func.func @transform_4(%arg0: i32) -> (i32, i32) {
    %c0_i32 = arith.constant 0 : i32
    %c0_i32_0 = arith.constant 0 : i32
    %c0_i32_1 = arith.constant 0 : i32
    return %c0_i32, %c0_i32_0 : i32, i32
  }
  func.func @transform_5(%arg0: i32) -> (i32, i32) {
    %c0_i32 = arith.constant 0 : i32
    %c0_i32_0 = arith.constant 0 : i32
    return %c0_i32, %arg0 : i32, i32
  }
}

</mosaic_0001>

<bundles_post_ra>
// kernel: tpu_custom_call.1
= control target key start
LH: loop header
LB: loop body
LE: loop exit
PB: predicated region body
PF: predicated region fallthrough
CT: control target
= control target key end

     0   :  { %s1330_s0 = inlined_call_operand.vmem [shape: f32[16,16], index: 0, kind: input, shape index: {}]   ;;  %s1331_s1 = inlined_call_operand.vmem [shape: f32[128,16], index: 1, kind: input, shape index: {}]   ;;  %s1332_s2 = inlined_call_operand.vmem [shape: f32[128,128], index: 2, kind: input, shape index: {}]   ;;  %s1333_s3 = inlined_call_operand.vmem [shape: f32[128,3], index: 3, kind: input, shape index: {}]   ;;  %s1334_s4 = inlined_call_operand.<no memory space> [shape: f32[1,1], index: 4, kind: input, shape index: {}]   ;;  %s1335_s5 = inlined_call_operand.hbm [shape: f32[1,16], index: 5, kind: output, shape index: {}]  }
   0x1   :  { %v10_v0 = vstv %s1334_s4 }
   0x2   :  { %11 = vst [vmem:[#allocation2] sm:$0x1] %v10_v0 }
   0x3   :  { %v23_v1 = vld [vmem:[%s1330_s0] sm:$0xff]  ;;  %v24_v2 = vld [vmem:[%s1330_s0 + $0x8] sm:$0xff]  ;;  %vm137_vm0 = vcmask 130048   ;;  %v988_v5 = vmov 0   ;;  %v1047_v7 = vld [vmem:[%s1333_s3 + $0x10] sm:$0xff] }
   0x4   :  { %v25_v3 = vld [vmem:[%s1331_s1] sm:$0xff]  ;;  %v890_v4 = vpack.c.bf16 %v24_v2, %v23_v1  ;;  %vm891_vm1 = vmpackc.low %vm137_vm0, %vm137_vm0  ;;  %948 = vset.pattern.permute.xlu0 %v988_v5  ;;  %949 = vset.pattern.permute.xlu1 %v988_v5  ;;  %v26_v8 = vld [vmem:[%s1331_s1 + $0x8] sm:$0xff] }
   0x5   :  { %810 = vmatprep.mubr.msk.f32.mxu0 %vm137_vm0, %v25_v3  ;;  %v1042_v6 = vld [vmem:[%s1333_s3] sm:$0xff]  ;;  %69 = vperm.xlu1 %949, %v1047_v7   ;;  %v1057_v9 = vld [vmem:[%s1333_s3 + $0x8] sm:$0xff]  ;;  %v27_v10 = vld [vmem:[%s1331_s1 + $0x10] sm:$0xff] }
   0x6   :  { %892 = vmatprep.subr.msk.bf16.mxu0 %vm891_vm1, %v890_v4  ;;  %59 = vperm.xlu0 %948, %v1042_v6   ;;  %v1065_v11 = vld [vmem:[%s1333_s3 + $0x18] sm:$0xff] }
   0x7   :  { %895 = vmatpush3.bf16.xpose.msk.msra.mxu0 %vm891_vm1, %v890_v4 }
   0xa   :  { %64 = vperm.xlu0 %948, %v1057_v9  }
   0xe   :  { %811 = vmatmul.mubr.msk.f32.vlgmr.msra.gmra.mrb[0].mxu0 %vm137_vm0, %v26_v8 }
   0xf   :  { %12 = vsyncpa [#allocation4], 0  ;;  %813 = vmatprep.mubr.msk.f32.mxu0 %vm137_vm0, %v27_v10  ;;  %v28_v12 = vld [vmem:[%s1331_s1 + $0x18] sm:$0xff]  ;;  %74 = vperm.xlu1 %949, %v1065_v11   ;;  %v45_v13 = vld [vmem:[%s1333_s3 + $0x20] sm:$0xff]  ;;  %v989_v39 = vmov 1   ;;  %v990_v40 = vmov 2  }
  0x10   :  { %v29_v14 = vld [vmem:[%s1331_s1 + $0x20] sm:$0xff]  ;;  %v1083_v15 = vld [vmem:[%s1333_s3 + $0x28] sm:$0xff]  ;;  %79 = vperm.xlu0 %948, %v45_v13   ;;  %v1094_v17 = vld [vmem:[%s1333_s3 + $0x30] sm:$0xff]  ;;  %vm722_vm2 = vcmask 122880  }
  0x11   :  { %v30_v16 = vld [vmem:[%s1331_s1 + $0x28] sm:$0xff]  ;;  %v31_v18 = vld [vmem:[%s1331_s1 + $0x30] sm:$0xff]  ;;  %v1102_v19 = vld [vmem:[%s1333_s3 + $0x38] sm:$0xff] }
  0x12   :  { %814 = vmatmul.mubr.msk.f32.gmra.mrb[2].mxu0 %vm137_vm0, %v28_v12  ;;  %v32_v20 = vld [vmem:[%s1331_s1 + $0x38] sm:$0xff]  ;;  %v1114_v21 = vld [vmem:[%s1333_s3 + $0x40] sm:$0xff]  ;;  %v1122_v23 = vld [vmem:[%s1333_s3 + $0x48] sm:$0xff] }
  0x13   :  { %816 = vmatprep.mubr.msk.f32.mxu0 %vm137_vm0, %v29_v14  ;;  %84 = vperm.xlu1 %949, %v1083_v15   ;;  %v33_v22 = vld [vmem:[%s1331_s1 + $0x40] sm:$0xff]  ;;  %v34_v24 = vld [vmem:[%s1331_s1 + $0x48] sm:$0xff]  ;;  %v1134_v25 = vld [vmem:[%s1333_s3 + $0x50] sm:$0xff] }
  0x14   :  { %89 = vperm.xlu0 %948, %v1094_v17   ;;  %v35_v26 = vld [vmem:[%s1331_s1 + $0x50] sm:$0xff]  ;;  %v1142_v27 = vld [vmem:[%s1333_s3 + $0x58] sm:$0xff]  ;;  %v1154_v29 = vld [vmem:[%s1333_s3 + $0x60] sm:$0xff] }
  0x15   :  { %v36_v28 = vld [vmem:[%s1331_s1 + $0x58] sm:$0xff]  ;;  %v37_v30 = vld [vmem:[%s1331_s1 + $0x60] sm:$0xff]  ;;  %v1162_v31 = vld [vmem:[%s1333_s3 + $0x68] sm:$0xff] }
  0x16   :  { %817 = vmatmul.mubr.msk.f32.gmra.mrb[4].mxu0 %vm137_vm0, %v30_v16  ;;  %v38_v32 = vld [vmem:[%s1331_s1 + $0x68] sm:$0xff]  ;;  %v1174_v33 = vld [vmem:[%s1333_s3 + $0x70] sm:$0xff]  ;;  %v1182_v35 = vld [vmem:[%s1333_s3 + $0x78] sm:$0xff] }
  0x17   :  { %819 = vmatprep.mubr.msk.f32.mxu0 %vm137_vm0, %v31_v18  ;;  %94 = vperm.xlu1 %949, %v1102_v19   ;;  %v39_v34 = vld [vmem:[%s1331_s1 + $0x70] sm:$0xff]  ;;  %v40_v36 = vld [vmem:[%s1331_s1 + $0x78] sm:$0xff]  ;;  %v353_v37 = vld [vmem:[%s1332_s2] sm:$0xff] }
  0x18   :  { %99 = vperm.xlu0 %948, %v1114_v21   ;;  %v359_v38 = vld [vmem:[%s1332_s2 + $0x30] sm:$0xff]  ;;  %v711_v41 = vld [vmem:[#allocation2] sm:$0x1] }
  0x19   :  { %875 = vmatprep.mubr.f32.mxu1 %v359_v38 }
  0x1a   :  { %820 = vmatmul.mubr.msk.f32.gmra.mrb[6].mxu0 %vm137_vm0, %v32_v20 }
  0x1b   :  { %822 = vmatprep.mubr.msk.f32.mxu0 %vm137_vm0, %v33_v22  ;;  %104 = vperm.xlu1 %949, %v1122_v23  }
  0x1c   :  { %109 = vperm.xlu0 %948, %v1134_v25  }
  0x1e   :  { %823 = vmatmul.mubr.msk.f32.gmra.mrb[8].mxu0 %vm137_vm0, %v34_v24 }
  0x1f   :  { %825 = vmatprep.mubr.msk.f32.mxu0 %vm137_vm0, %v35_v26  ;;  %114 = vperm.xlu1 %949, %v1142_v27  }
  0x20   :  { %119 = vperm.xlu0 %948, %v1154_v29  }
  0x22   :  { %826 = vmatmul.mubr.msk.f32.gmra.mrb[10].mxu0 %vm137_vm0, %v36_v28 }
  0x23   :  { %828 = vmatprep.mubr.msk.f32.mxu0 %vm137_vm0, %v37_v30  ;;  %124 = vperm.xlu1 %949, %v1162_v31  }
  0x24   :  { %129 = vperm.xlu0 %948, %v1174_v33  }
  0x26   :  { %829 = vmatmul.mubr.msk.f32.gmra.mrb[12].mxu0 %vm137_vm0, %v38_v32 }
  0x27   :  { %831 = vmatprep.mubr.msk.f32.mxu0 %vm137_vm0, %v39_v34  ;;  %134 = vperm.xlu1 %949, %v1182_v35  }
  0x28   :  { %951 = vset.pattern.permute.xlu0 %v990_v40 }
  0x29   :  { %595 = vperm.xlu0 %951, %v1042_v6  }
  0x2a   :  { %832 = vmatmul.mubr.msk.f32.gmra.mrb[14].mxu0 %vm137_vm0, %v40_v36 }
  0x2b   :  { %866 = vmatprep.mubr.f32.mxu0 %v353_v37  ;;  %950 = vset.pattern.permute.xlu1 %v989_v39 }
  0x2c   :  { %374 = vperm.xlu1 %950, %v1057_v9  }
  0x2d   :  { %611 = vperm.xlu0 %951, %v45_v13  }
  0x30   :  { %378 = vperm.xlu1 %950, %v1047_v7  }
  0x31   :  { %623 = vperm.xlu0 %951, %v1102_v19  }
  0x34   :  { %386 = vperm.xlu1 %950, %v45_v13  }
  0x35   :  { %635 = vperm.xlu0 %951, %v1134_v25  }
  0x38   :  { %952 = vset.pattern.permute.xlu1 %v990_v40 }
  0x39   :  { %599 = vperm.xlu1 %952, %v1057_v9   ;;  %958 = vset.pattern.permute.xlu0 %v989_v39 }
  0x3a   :  { %370 = vperm.xlu0 %958, %v1042_v6  }
  0x3d   :  { %603 = vperm.xlu1 %952, %v1047_v7  }
  0x3e   :  { %382 = vperm.xlu0 %958, %v1065_v11  }
  0x41   :  { %607 = vperm.xlu1 %952, %v1065_v11  }
  0x42   :  { %390 = vperm.xlu0 %958, %v1083_v15  }
  0x45   :  { %953 = vset.pattern.permute.xlu1 %v989_v39 }
  0x46   :  { %394 = vperm.xlu1 %953, %v1094_v17   ;;  %402 = vperm.xlu0 %958, %v1114_v21  }
  0x4a   :  { %398 = vperm.xlu1 %953, %v1102_v19   ;;  %414 = vperm.xlu0 %958, %v1142_v27  }
  0x4e   :  { %954 = vset.pattern.permute.xlu1 %v990_v40  ;;  %426 = vperm.xlu0 %958, %v1174_v33  }
  0x4f   :  { %615 = vperm.xlu1 %954, %v1083_v15  }
  0x52   :  { %961 = vset.pattern.permute.xlu0 %v990_v40 }
  0x53   :  { %619 = vperm.xlu1 %954, %v1094_v17   ;;  %647 = vperm.xlu0 %961, %v1162_v31  }
  0x57   :  { %955 = vset.pattern.permute.xlu1 %v989_v39  ;;  %963 = vset.pattern.permute.xlu0 %v988_v5 }
  0x58   :  { %406 = vperm.xlu1 %955, %v1122_v23   ;;  %714 = vperm.xlu0 %963, %v711_v41  }
  0x5c   :  { %410 = vperm.xlu1 %955, %v1134_v25  }
  0x60   :  { %956 = vset.pattern.permute.xlu1 %v990_v40 }
  0x61   :  { %627 = vperm.xlu1 %956, %v1114_v21  }
  0x65   :  { %631 = vperm.xlu1 %956, %v1122_v23  }
  0x69   :  { %957 = vset.pattern.permute.xlu1 %v989_v39 }
  0x6a   :  { %418 = vperm.xlu1 %957, %v1154_v29  }
  0x6e   :  { %422 = vperm.xlu1 %957, %v1162_v31  }
  0x72   :  { %959 = vset.pattern.permute.xlu1 %v990_v40 }
  0x73   :  { %639 = vperm.xlu1 %959, %v1142_v27  }
  0x77   :  { %643 = vperm.xlu1 %959, %v1154_v29  }
  0x7b   :  { %960 = vset.pattern.permute.xlu1 %v989_v39 }
  0x7c   :  { %430 = vperm.xlu1 %960, %v1182_v35  }
  0x80   :  { %962 = vset.pattern.permute.xlu1 %v990_v40 }
  0x81   :  { %651 = vperm.xlu1 %962, %v1174_v33  }
  0x84   :  { %v70_v42 = vpop.permute.xlu1 %69 }
  0x85   :  { %v60_v43 = vpop.permute.xlu0 %59  ;;  %655 = vperm.xlu1 %962, %v1182_v35  }
  0x89   :  { %v65_v45 = vpop.permute.xlu0 %64 }
  0x8e   :  { %v75_v44 = vpop.permute.xlu1 %74 }
  0x8f   :  { %v80_v47 = vpop.permute.xlu0 %79 }
  0x92   :  { %v85_v46 = vpop.permute.xlu1 %84 }
  0x93   :  { %v90_v56 = vpop.permute.xlu0 %89 }
  0x96   :  { %v95_v53 = vpop.permute.xlu1 %94 }
  0x97   :  { %v100_v5 = vpop.permute.xlu0 %99 }
  0x9a   :  { %v105_v2 = vpop.permute.xlu1 %104 }
  0x9b   :  { %v110_v17 = vpop.permute.xlu0 %109 }
  0x9e   :  { %v115_v14 = vpop.permute.xlu1 %114 }
  0x9f   :  { %v120_v30 = vpop.permute.xlu0 %119 }
  0xa2   :  { %v125_v27 = vpop.permute.xlu1 %124 }
  0xa6   :  { %v135_v40 = vpop.permute.xlu1 %134 }
  0xe1   :  { %v812_v48 = vpop.f32.mrb[0].mxu0 }
  0xe2   :  { %v264_v49 = vadd.f32 %v812_v48, %v65_v45  ;;  %v258_v50 = vpop.f32.mrb[1].mxu0 }
  0xe3   :  { %v259_v51 = vadd.f32 %v258_v50, %v60_v43  ;;  %v130_v43 = vpop.permute.xlu0 %129  ;;  %v354_v50 = vld [vmem:[%s1332_s2 + $0x8] sm:$0xff] }
  0xe4   :  { %v338_v52 = vmax.f32 %v264_v49, 0.0 }
  0xe5   :  { %v337_v54 = vmax.f32 %v259_v51, 0.0  ;;  %v815_v55 = vpop.f32.mrb[2].mxu0  ;;  %v360_v51 = vld [vmem:[%s1332_s2 + $0x38] sm:$0xff] }
  0xe6   :  { %v274_v57 = vadd.f32 %v815_v55, %v75_v44  ;;  %v268_v58 = vpop.f32.mrb[3].mxu0  ;;  %v362_v55 = vld [vmem:[%s1332_s2 + $0x48] sm:$0xff] }
  0xe7   :  { %v896_v59 = vpack.c.bf16 %v338_v52, %v337_v54  ;;  %v269_v60 = vadd.f32 %v268_v58, %v70_v42  ;;  %v355_v52 = vld [vmem:[%s1332_s2 + $0x10] sm:$0xff]  ;;  %v356_v54 = vld [vmem:[%s1332_s2 + $0x18] sm:$0xff]  ;;  %v358_v58 = vld [vmem:[%s1332_s2 + $0x28] sm:$0xff] }
  0xe8   :  { %v340_v61 = vmax.f32 %v274_v57, 0.0  ;;  %v363_v57 = vld [vmem:[%s1332_s2 + $0x50] sm:$0xff] }
  0xe9   :  { %v339_v62 = vmax.f32 %v269_v60, 0.0  ;;  %v818_v63 = vpop.f32.mrb[4].mxu0  ;;  %897 = vmatprep.subr.bf16.mxu0 %v896_v59  ;;  %928 = vmatprep.subr.bf16.mxu1 %v896_v59  ;;  %v365_v60 = vld [vmem:[%s1332_s2 + $0x60] sm:$0xff] }
  0xea   :  { %v284_v0 = vadd.f32 %v818_v63, %v85_v46  ;;  %v278_v1 = vpop.f32.mrb[5].mxu0  ;;  %899 = vmatpush3.bf16.msra.mxu0 %v896_v59  ;;  %936 = vmatpush3.bf16.msra.mxu1 %v896_v59  ;;  %v364_v59 = vld [vmem:[%s1332_s2 + $0x58] sm:$0xff] }
  0xeb   :  { %v900_v3 = vpack.c.bf16 %v340_v61, %v339_v62  ;;  %v279_v4 = vadd.f32 %v278_v1, %v80_v47  ;;  %v366_v61 = vld [vmem:[%s1332_s2 + $0x68] sm:$0xff]  ;;  %v367_v62 = vld [vmem:[%s1332_s2 + $0x70] sm:$0xff]  ;;  %v368_v63 = vld [vmem:[%s1332_s2 + $0x78] sm:$0xff] }
  0xec   :  { %v342_v6 = vmax.f32 %v284_v0, 0.0  ;;  %v375_v0 = vpop.permute.xlu1 %374 }
  0xed   :  { %v341_v7 = vmax.f32 %v279_v4, 0.0  ;;  %v821_v8 = vpop.f32.mrb[6].mxu0  ;;  %901 = vmatprep.subr.bf16.mxu0 %v900_v3  ;;  %929 = vmatprep.subr.bf16.mxu1 %v900_v3 }
  0xee   :  { %v294_v9 = vadd.f32 %v821_v8, %v95_v53  ;;  %v288_v10 = vpop.f32.mrb[7].mxu0  ;;  %903 = vmatpush3.bf16.msra.mxu0 %v900_v3  ;;  %937 = vmatpush3.bf16.msra.mxu1 %v900_v3  ;;  %v361_v53 = vld [vmem:[%s1332_s2 + $0x40] sm:$0xff] }
  0xef   :  { %v904_v11 = vpack.c.bf16 %v342_v6, %v341_v7  ;;  %v289_v12 = vadd.f32 %v288_v10, %v90_v56  ;;  %v357_v56 = vld [vmem:[%s1332_s2 + $0x20] sm:$0xff]  ;;  %v596_v10 = vpop.permute.xlu0 %595  ;;  %s991_s2 = smov [#allocation3]  }
  0xf0   :  { %v344_v13 = vmax.f32 %v294_v9, 0.0  ;;  %v379_v1 = vpop.permute.xlu1 %378  ;;  %s730_s9 = sshll.u32 %s991_s2, 4  ;;  %s731_s9 = int_to_ptr.vmem [resolvable:$true] %s730_s9 }
  0xf1   :  { %v343_v15 = vmax.f32 %v289_v12, 0.0  ;;  %v824_v16 = vpop.f32.mrb[8].mxu0  ;;  %905 = vmatprep.subr.bf16.mxu0 %v904_v11  ;;  %930 = vmatprep.subr.bf16.mxu1 %v904_v11  ;;  %s964_s1 = scalar_lea.vmem %s731_s9, 16  ;;  %s968_s10 = scalar_lea.vmem %s731_s9, 32 }
  0xf2   :  { %v304_v18 = vadd.f32 %v824_v16, %v105_v2  ;;  %v298_v19 = vpop.f32.mrb[9].mxu0  ;;  %907 = vmatpush3.bf16.msra.mxu0 %v904_v11  ;;  %938 = vmatpush3.bf16.msra.mxu1 %v904_v11  ;;  %p965_p0 = scmp.ne.s32.totalorder %s731_s9, %s964_s1  ;;  %p969_p1 = scmp.lt.s32.totalorder %s731_s9, %s731_s9 }
  0xf3   :  { %v908_v20 = vpack.c.bf16 %v344_v13, %v343_v15  ;;  %v299_v21 = vadd.f32 %v298_v19, %v100_v5  ;;  %v612_v12 = vpop.permute.xlu0 %611  ;;  %p970_p2 = scmp.lt.s32.totalorder %s968_s10, %s964_s1 }
  0xf4   :  { %v346_v22 = vmax.f32 %v304_v18, 0.0  ;;  %v387_v2 = vpop.permute.xlu1 %386 }
  0xf5   :  { %v345_v23 = vmax.f32 %v299_v21, 0.0  ;;  %v827_v24 = vpop.f32.mrb[10].mxu0  ;;  %909 = vmatprep.subr.bf16.mxu0 %v908_v20  ;;  %931 = vmatprep.subr.bf16.mxu1 %v908_v20  ;;  %p971_p3 = por %p970_p2, %p969_p1 }
  0xf6   :  { %v314_v25 = vadd.f32 %v827_v24, %v115_v14  ;;  %v308_v26 = vpop.f32.mrb[11].mxu0  ;;  %911 = vmatpush3.bf16.msra.mxu0 %v908_v20  ;;  %939 = vmatpush3.bf16.msra.mxu1 %v908_v20 }
  0xf7   :  { %v912_v28 = vpack.c.bf16 %v346_v22, %v345_v23  ;;  %v309_v29 = vadd.f32 %v308_v26, %v110_v17  ;;  %v1284_v14 = vpop.permute.xlu0 %623  ;;  %p972_p4 = pnand %p971_p3, %p965_p0 }
  0xf8   :  { %v348_v31 = vmax.f32 %v314_v25, 0.0  ;;  %v600_v3 = vpop.permute.xlu1 %599 }
  0xf9   :  { %v347_v32 = vmax.f32 %v309_v29, 0.0  ;;  %v830_v34 = vpop.f32.mrb[12].mxu0  ;;  %913 = vmatprep.subr.bf16.mxu0 %v912_v28  ;;  %932 = vmatprep.subr.bf16.mxu1 %v912_v28 }
  0xfa   :  { %v324_v33 = vadd.f32 %v830_v34, %v125_v27  ;;  %v318_v36 = vpop.f32.mrb[13].mxu0  ;;  %915 = vmatpush3.bf16.msra.mxu0 %v912_v28  ;;  %940 = vmatpush3.bf16.msra.mxu1 %v912_v28 }
  0xfb   :  { %v916_v37 = vpack.c.bf16 %v348_v31, %v347_v32  ;;  %v319_v38 = vadd.f32 %v318_v36, %v120_v30  ;;  %v1288_v16 = vpop.permute.xlu0 %635 }
  0xfc   :  { %v350_v39 = vmax.f32 %v324_v33, 0.0  ;;  %v604_v4 = vpop.permute.xlu1 %603 }
  0xfd   :  { %v349_v41 = vmax.f32 %v319_v38, 0.0  ;;  %v833_v42 = vpop.f32.mrb[14].mxu0  ;;  %917 = vmatprep.subr.bf16.mxu0 %v916_v37  ;;  %933 = vmatprep.subr.bf16.mxu1 %v916_v37 }
  0xfe   :  { %v334_v35 = vadd.f32 %v833_v42, %v135_v40  ;;  %v328_v44 = vpop.f32.mrb[15].mxu0  ;;  %919 = vmatpush3.bf16.msra.mxu0 %v916_v37  ;;  %941 = vmatpush3.bf16.msra.mxu1 %v916_v37 }
  0xff   :  { %v920_v45 = vpack.c.bf16 %v350_v39, %v349_v41  ;;  %v329_v46 = vadd.f32 %v328_v44, %v130_v43  ;;  %v371_v18 = vpop.permute.xlu0 %370 }
 0x100   :  { %v352_v47 = vmax.f32 %v334_v35, 0.0  ;;  %v608_v5 = vpop.permute.xlu1 %607 }
 0x101   :  { %v351_v48 = vmax.f32 %v329_v46, 0.0  ;;  %921 = vmatprep.subr.bf16.mxu0 %v920_v45  ;;  %934 = vmatprep.subr.bf16.mxu1 %v920_v45 }
 0x102   :  { %923 = vmatpush3.bf16.msra.mxu0 %v920_v45  ;;  %942 = vmatpush3.bf16.msra.mxu1 %v920_v45 }
 0x103   :  { %v924_v49 = vpack.c.bf16 %v352_v47, %v351_v48  ;;  %v383_v20 = vpop.permute.xlu0 %382 }
 0x104   :  { %v395_v6 = vpop.permute.xlu1 %394 }
 0x105   :  { %925 = vmatprep.subr.bf16.mxu0 %v924_v49  ;;  %935 = vmatprep.subr.bf16.mxu1 %v924_v49 }
 0x106   :  { %927 = vmatpush3.bf16.msra.mxu0 %v924_v49  ;;  %943 = vmatpush3.bf16.msra.mxu1 %v924_v49 }
 0x107   :  { %v391_v28 = vpop.permute.xlu0 %390 }
 0x108   :  { %v399_v7 = vpop.permute.xlu1 %398 }
 0x109   :  { %867 = vmatmul.mubr.f32.vlgmr.msra.gmra.mrb[16].mxu0 %v354_v50  ;;  %876 = vmatmul.mubr.f32.vlgmr.msra.gmra.mrb[0].mxu1 %v360_v51 }
 0x10a   :  { %869 = vmatprep.mubr.f32.mxu0 %v355_v52  ;;  %878 = vmatprep.mubr.f32.mxu1 %v361_v53 }
 0x10c   :  { %v616_v8 = vpop.permute.xlu1 %615 }
 0x10d   :  { %870 = vmatmul.mubr.f32.gmra.mrb[18].mxu0 %v356_v54  ;;  %879 = vmatmul.mubr.f32.gmra.mrb[2].mxu1 %v362_v55  ;;  %v403_v55 = vpop.permute.xlu0 %402 }
 0x10e   :  { %872 = vmatprep.mubr.f32.mxu0 %v357_v56  ;;  %881 = vmatprep.mubr.f32.mxu1 %v363_v57 }
 0x110   :  { %v620_v9 = vpop.permute.xlu1 %619 }
 0x111   :  { %873 = vmatmul.mubr.f32.gmra.mrb[20].mxu0 %v358_v58  ;;  %882 = vmatmul.mubr.f32.gmra.mrb[4].mxu1 %v364_v59 }
 0x112   :  { %884 = vmatprep.mubr.f32.mxu1 %v365_v60 }
 0x114   :  { %v407_v11 = vpop.permute.xlu1 %406 }
 0x115   :  { %885 = vmatmul.mubr.f32.gmra.mrb[6].mxu1 %v366_v61 }
 0x116   :  { %887 = vmatprep.mubr.f32.mxu1 %v367_v62 }
 0x118   :  { %v411_v13 = vpop.permute.xlu1 %410 }
 0x119   :  { %888 = vmatmul.mubr.f32.gmra.mrb[8].mxu1 %v368_v63 }
 0x11c   :  { %v1286_v15 = vpop.permute.xlu1 %627 }
 0x120   :  { %v1290_v17 = vpop.permute.xlu1 %631 }
 0x124   :  { %v1292_v19 = vpop.permute.xlu1 %418 }
 0x128   :  { %v1294_v21 = vpop.permute.xlu1 %422 }
 0x12c   :  { %v640_v42 = vpop.permute.xlu1 %639 }
 0x1dc   :  { %v868_v22 = vpop.f32.mrb[16].mxu0  ;;  %v877_v23 = vpop.f32.mrb[0].mxu1 }
 0x1dd   :  { %v505_v24 = vadd.f32 %v868_v22, %v375_v0  ;;  %v499_v25 = vpop.f32.mrb[17].mxu0  ;;  %v529_v26 = vpop.f32.mrb[1].mxu1  ;;  %v535_v47 = vadd.f32 %v877_v23, %v399_v7 }
 0x1de   :  { %v500_v27 = vadd.f32 %v499_v25, %v371_v18  ;;  %v530_v35 = vadd.f32 %v529_v26, %v395_v6  ;;  %v415_v23 = vpop.permute.xlu0 %414 }
 0x1df   :  { %v579_v29 = vmax.f32 %v505_v24, 0.0  ;;  %v585_v62 = vmax.f32 %v535_v47, 0.0 }
 0x1e0   :  { %v578_v30 = vmax.f32 %v500_v27, 0.0  ;;  %v871_v31 = vpop.f32.mrb[18].mxu0  ;;  %v880_v32 = vpop.f32.mrb[2].mxu1  ;;  %v584_v57 = vmax.f32 %v530_v35, 0.0 }
 0x1e1   :  { %v659_v34 = vmul.f32 %v600_v3, %v579_v29  ;;  %v515_v33 = vadd.f32 %v871_v31, %v383_v20  ;;  %v509_v36 = vpop.f32.mrb[19].mxu0  ;;  %v539_v37 = vpop.f32.mrb[3].mxu1  ;;  %v545_v3 = vadd.f32 %v880_v32, %v407_v11  ;;  %v665_v26 = vmul.f32 %v1284_v14, %v585_v62 }
 0x1e2   :  { %v658_v38 = vmul.f32 %v596_v10, %v578_v30  ;;  %v510_v39 = vadd.f32 %v509_v36, %v379_v1  ;;  %v540_v59 = vadd.f32 %v539_v37, %v403_v55  ;;  %v427_v36 = vpop.permute.xlu0 %426 }
 0x1e3   :  { %v675_v40 = vsel %vm137_vm0, %v659_v34, 0.0  ;;  %v581_v41 = vmax.f32 %v515_v33, 0.0  ;;  %v587_v27 = vmax.f32 %v545_v3, 0.0  ;;  %v687_v32 = vsel %vm137_vm0, %v665_v26, 0.0 }
 0x1e4   :  { %v674_v43 = vsel %vm137_vm0, %v658_v38, 0.0  ;;  %v580_v44 = vmax.f32 %v510_v39, 0.0  ;;  %v874_v45 = vpop.f32.mrb[20].mxu0  ;;  %v883_v46 = vpop.f32.mrb[4].mxu1 }
 0x1e5   :  { %v676_v48 = vadd.f32 %v675_v40, %v674_v43  ;;  %v525_v49 = vadd.f32 %v874_v45, %v391_v28  ;;  %v519_v50 = vpop.f32.mrb[21].mxu0  ;;  %v549_v51 = vpop.f32.mrb[5].mxu1  ;;  %v661_v52 = vmul.f32 %v608_v5, %v581_v41  ;;  %v555_v29 = vadd.f32 %v883_v46, %v415_v23 }
 0x1e6   :  { %v660_v53 = vmul.f32 %v604_v4, %v580_v44  ;;  %v520_v54 = vadd.f32 %v519_v50, %v387_v2  ;;  %v644_v5 = vpop.permute.xlu1 %643  ;;  %v664_v4 = vmul.f32 %v620_v9, %v584_v57  ;;  %v586_v2 = vmax.f32 %v540_v59, 0.0  ;;  %v648_v46 = vpop.permute.xlu0 %647 }
 0x1e7   :  { %v583_v56 = vmax.f32 %v525_v49, 0.0  ;;  %v679_v1 = vsel %vm137_vm0, %v661_v52, 0.0  ;;  %v550_v20 = vadd.f32 %v549_v51, %v411_v13  ;;  %v667_v34 = vmul.f32 %v1290_v17, %v587_v27 }
 0x1e8   :  { %v677_v58 = vsel %vm137_vm0, %v660_v53, 0.0  ;;  %v582_v60 = vmax.f32 %v520_v54, 0.0  ;;  %v886_v61 = vpop.f32.mrb[6].mxu1  ;;  %v589_v33 = vmax.f32 %v555_v29, 0.0 }
 0x1e9   :  { %v678_v63 = vadd.f32 %v677_v58, %v676_v48  ;;  %v559_v0 = vpop.f32.mrb[7].mxu1  ;;  %v663_v6 = vmul.f32 %v616_v8, %v583_v56  ;;  %v685_v8 = vsel %vm137_vm0, %v664_v4, 0.0  ;;  %v588_v9 = vmax.f32 %v550_v20, 0.0 }
 0x1ea   :  { %v662_v7 = vmul.f32 %v612_v12, %v582_v60  ;;  %v666_v12 = vmul.f32 %v1286_v15, %v586_v2  ;;  %v560_v30 = vadd.f32 %v559_v0, %v1292_v19  ;;  %v431_v13 = vpop.permute.xlu1 %430  ;;  %v565_v14 = vadd.f32 %v886_v61, %v1294_v21 }
 0x1eb   :  { %v680_v10 = vadd.f32 %v679_v1, %v678_v63  ;;  %v683_v28 = vsel %vm137_vm0, %v663_v6, 0.0  ;;  %v668_v39 = vmul.f32 %v1288_v16, %v588_v9  ;;  %v691_v19 = vsel %vm137_vm0, %v667_v34, 0.0 }
 0x1ec   :  { %v681_v18 = vsel %vm137_vm0, %v662_v7, 0.0  ;;  %v889_v22 = vpop.f32.mrb[8].mxu1  ;;  %v689_v38 = vsel %vm137_vm0, %v666_v12, 0.0  ;;  %v590_v40 = vmax.f32 %v560_v30, 0.0  ;;  %v669_v43 = vmul.f32 %v640_v42, %v589_v33 }
 0x1ed   :  { %v682_v24 = vadd.f32 %v681_v18, %v680_v10  ;;  %v569_v25 = vpop.f32.mrb[9].mxu1  ;;  %v591_v35 = vmax.f32 %v565_v14, 0.0  ;;  %v575_v44 = vadd.f32 %v889_v22, %v431_v13  ;;  %v693_v47 = vsel %vm137_vm0, %v668_v39, 0.0  ;;  %v715_v10 = vpop.permute.xlu0 %714 }
 0x1ee   :  { %v570_v15 = vadd.f32 %v569_v25, %v427_v36  ;;  %v652_v17 = vpop.permute.xlu1 %651  ;;  %v670_v21 = vmul.f32 %v644_v5, %v590_v40  ;;  %v695_v50 = vsel %vm137_vm0, %v669_v43, 0.0  ;;  %v717_v61 = vlaneseq }
 0x1ef   :  { %v684_v11 = vadd.f32 %v683_v28, %v682_v24  ;;  %v671_v51 = vmul.f32 %v648_v46, %v591_v35  ;;  %v593_v16 = vmax.f32 %v575_v44, 0.0 }
 0x1f0   :  { %v592_v48 = vmax.f32 %v570_v15, 0.0  ;;  %v697_v54 = vsel %vm137_vm0, %v670_v21, 0.0  ;;  %v718_v1 = vshrl.u32 %v717_v61, 7 }
 0x1f1   :  { %v686_v31 = vadd.f32 %v685_v8, %v684_v11  ;;  %v699_v56 = vsel %vm137_vm0, %v671_v51, 0.0 }
 0x1f2   :  { %v656_v53 = vpop.permute.xlu1 %655  ;;  %v672_v55 = vmul.f32 %v652_v17, %v592_v48  ;;  %v719_v7 = vsub.s32 0, %v718_v1 }
 0x1f3   :  { %v688_v37 = vadd.f32 %v687_v32, %v686_v31  ;;  %v673_v57 = vmul.f32 %v656_v53, %v593_v16 }
 0x1f4   :  { %v701_v59 = vsel %vm137_vm0, %v672_v55, 0.0  ;;  %v720_v2 = vrot.slane %v715_v10, %v719_v7 }
 0x1f5   :  { %v690_v41 = vadd.f32 %v689_v38, %v688_v37  ;;  %v703_v62 = vsel %vm137_vm0, %v673_v57, 0.0 }
 0x1f7   :  { %v692_v45 = vadd.f32 %v691_v19, %v690_v41 }
 0x1f9   :  { %v694_v49 = vadd.f32 %v693_v47, %v692_v45 }
 0x1fb   :  { %v696_v52 = vadd.f32 %v695_v50, %v694_v49 }
 0x1fd   :  { %v698_v42 = vadd.f32 %v697_v54, %v696_v52 }
 0x1ff   :  { %v700_v58 = vadd.f32 %v699_v56, %v698_v42 }
 0x201   :  { %v702_v60 = vadd.f32 %v701_v59, %v700_v58 }
 0x203   :  { %v704_v63 = vadd.f32 %v703_v62, %v702_v60 }
 0x205   :  { %v705_v0 = vrot.slane %v704_v63, 4 }
 0x207   :  { %v706_v3 = vadd.f32 %v705_v0, %v704_v63 }
 0x209   :  { %v707_v6 = vrot.slane %v706_v3, 2 }
 0x20b   :  { %v708_v5 = vadd.f32 %v707_v6, %v706_v3 }
 0x20d   :  { %v709_v4 = vrot.slane %v708_v5, 1 }
 0x20f   :  { %v710_v18 = vadd.f32 %v709_v4, %v708_v5 }
 0x211   :  { %v721_v20 = vadd.f32 %v720_v2, %v710_v18 }
 0x213   :  { %723 = vst.msk [vmem:[#allocation3] sm:$0x1] %vm722_vm2, %v721_v20 }
 0x214   :  { %975 = shalt.err (!%p972_p4)
}
 0x215   :  { %s976_s13 = scalar_lea.hbm %s1335_s5, 16 }
 0x216   :  { %p977_p5 = scmp.ne.s32.totalorder %s1335_s5, %s976_s13  ;;  %p980_p6 = scmp.lt.u32.totalorder %s976_s13, %s1335_s5 }
 0x218   :  { %p982_p7 = pnand %p980_p6, %p977_p5 }
 0x21a   :  { %985 = shalt.err (!%p982_p7)
}
 0x21b   :  { %733 = dma.vmem_to_hbm [thread:$0]  %s731_s9, 16, %s1335_s5, [#allocation4]  }
 0x21c   :  { %986 = dma.done.wait [#allocation4], 16  }
 0x21d   :  { %987 = vsyncadd [#allocation4], 4294967280 }
 0x21e   :  { %737 = vsyncpa [#allocation4], 1 }

// kernel: tpu_custom_call.1
= control target key start
LH: loop header
LB: loop body
LE: loop exit
PB: predicated region body
PF: predicated region fallthrough
CT: control target
= control target key end

     0   :  { %s1330_s0 = inlined_call_operand.vmem [shape: f32[16,16], index: 0, kind: input, shape index: {}]   ;;  %s1331_s1 = inlined_call_operand.vmem [shape: f32[128,16], index: 1, kind: input, shape index: {}]   ;;  %s1332_s2 = inlined_call_operand.vmem [shape: f32[128,128], index: 2, kind: input, shape index: {}]   ;;  %s1333_s3 = inlined_call_operand.vmem [shape: f32[128,3], index: 3, kind: input, shape index: {}]   ;;  %s1334_s4 = inlined_call_operand.<no memory space> [shape: f32[1,1], index: 4, kind: input, shape index: {}]   ;;  %s1335_s5 = inlined_call_operand.hbm [shape: f32[1,16], index: 5, kind: output, shape index: {}]  }
   0x1   :  { %v10_v0 = vstv %s1334_s4 }
   0x2   :  { %11 = vst [vmem:[#allocation2] sm:$0x1] %v10_v0 }
   0x3   :  { %v23_v1 = vld [vmem:[%s1330_s0] sm:$0xff]  ;;  %v24_v2 = vld [vmem:[%s1330_s0 + $0x8] sm:$0xff]  ;;  %vm137_vm0 = vcmask 130048   ;;  %v988_v5 = vmov 0   ;;  %v1047_v7 = vld [vmem:[%s1333_s3 + $0x10] sm:$0xff] }
   0x4   :  { %v25_v3 = vld [vmem:[%s1331_s1] sm:$0xff]  ;;  %v890_v4 = vpack.c.bf16 %v24_v2, %v23_v1  ;;  %vm891_vm1 = vmpackc.low %vm137_vm0, %vm137_vm0  ;;  %948 = vset.pattern.permute.xlu0 %v988_v5  ;;  %949 = vset.pattern.permute.xlu1 %v988_v5  ;;  %v26_v8 = vld [vmem:[%s1331_s1 + $0x8] sm:$0xff] }
   0x5   :  { %810 = vmatprep.mubr.msk.f32.mxu0 %vm137_vm0, %v25_v3  ;;  %v1042_v6 = vld [vmem:[%s1333_s3] sm:$0xff]  ;;  %69 = vperm.xlu1 %949, %v1047_v7   ;;  %v1057_v9 = vld [vmem:[%s1333_s3 + $0x8] sm:$0xff]  ;;  %v27_v10 = vld [vmem:[%s1331_s1 + $0x10] sm:$0xff] }
   0x6   :  { %892 = vmatprep.subr.msk.bf16.mxu0 %vm891_vm1, %v890_v4  ;;  %59 = vperm.xlu0 %948, %v1042_v6   ;;  %v1065_v11 = vld [vmem:[%s1333_s3 + $0x18] sm:$0xff] }
   0x7   :  { %895 = vmatpush3.bf16.xpose.msk.msra.mxu0 %vm891_vm1, %v890_v4 }
   0xa   :  { %64 = vperm.xlu0 %948, %v1057_v9  }
   0xe   :  { %811 = vmatmul.mubr.msk.f32.vlgmr.msra.gmra.mrb[0].mxu0 %vm137_vm0, %v26_v8 }
   0xf   :  { %12 = vsyncpa [#allocation4], 0  ;;  %813 = vmatprep.mubr.msk.f32.mxu0 %vm137_vm0, %v27_v10  ;;  %v28_v12 = vld [vmem:[%s1331_s1 + $0x18] sm:$0xff]  ;;  %74 = vperm.xlu1 %949, %v1065_v11   ;;  %v45_v13 = vld [vmem:[%s1333_s3 + $0x20] sm:$0xff]  ;;  %v989_v39 = vmov 1   ;;  %v990_v40 = vmov 2  }
  0x10   :  { %v29_v14 = vld [vmem:[%s1331_s1 + $0x20] sm:$0xff]  ;;  %v1083_v15 = vld [vmem:[%s1333_s3 + $0x28] sm:$0xff]  ;;  %79 = vperm.xlu0 %948, %v45_v13   ;;  %v1094_v17 = vld [vmem:[%s1333_s3 + $0x30] sm:$0xff]  ;;  %vm722_vm2 = vcmask 122880  }
  0x11   :  { %v30_v16 = vld [vmem:[%s1331_s1 + $0x28] sm:$0xff]  ;;  %v31_v18 = vld [vmem:[%s1331_s1 + $0x30] sm:$0xff]  ;;  %v1102_v19 = vld [vmem:[%s1333_s3 + $0x38] sm:$0xff] }
  0x12   :  { %814 = vmatmul.mubr.msk.f32.gmra.mrb[2].mxu0 %vm137_vm0, %v28_v12  ;;  %v32_v20 = vld [vmem:[%s1331_s1 + $0x38] sm:$0xff]  ;;  %v1114_v21 = vld [vmem:[%s1333_s3 + $0x40] sm:$0xff]  ;;  %v1122_v23 = vld [vmem:[%s1333_s3 + $0x48] sm:$0xff] }
  0x13   :  { %816 = vmatprep.mubr.msk.f32.mxu0 %vm137_vm0, %v29_v14  ;;  %84 = vperm.xlu1 %949, %v1083_v15   ;;  %v33_v22 = vld [vmem:[%s1331_s1 + $0x40] sm:$0xff]  ;;  %v34_v24 = vld [vmem:[%s1331_s1 + $0x48] sm:$0xff]  ;;  %v1134_v25 = vld [vmem:[%s1333_s3 + $0x50] sm:$0xff] }
  0x14   :  { %89 = vperm.xlu0 %948, %v1094_v17   ;;  %v35_v26 = vld [vmem:[%s1331_s1 + $0x50] sm:$0xff]  ;;  %v1142_v27 = vld [vmem:[%s1333_s3 + $0x58] sm:$0xff]  ;;  %v1154_v29 = vld [vmem:[%s1333_s3 + $0x60] sm:$0xff] }
  0x15   :  { %v36_v28 = vld [vmem:[%s1331_s1 + $0x58] sm:$0xff]  ;;  %v37_v30 = vld [vmem:[%s1331_s1 + $0x60] sm:$0xff]  ;;  %v1162_v31 = vld [vmem:[%s1333_s3 + $0x68] sm:$0xff] }
  0x16   :  { %817 = vmatmul.mubr.msk.f32.gmra.mrb[4].mxu0 %vm137_vm0, %v30_v16  ;;  %v38_v32 = vld [vmem:[%s1331_s1 + $0x68] sm:$0xff]  ;;  %v1174_v33 = vld [vmem:[%s1333_s3 + $0x70] sm:$0xff]  ;;  %v1182_v35 = vld [vmem:[%s1333_s3 + $0x78] sm:$0xff] }
  0x17   :  { %819 = vmatprep.mubr.msk.f32.mxu0 %vm137_vm0, %v31_v18  ;;  %94 = vperm.xlu1 %949, %v1102_v19   ;;  %v39_v34 = vld [vmem:[%s1331_s1 + $0x70] sm:$0xff]  ;;  %v40_v36 = vld [vmem:[%s1331_s1 + $0x78] sm:$0xff]  ;;  %v353_v37 = vld [vmem:[%s1332_s2] sm:$0xff] }
  0x18   :  { %99 = vperm.xlu0 %948, %v1114_v21   ;;  %v359_v38 = vld [vmem:[%s1332_s2 + $0x30] sm:$0xff]  ;;  %v711_v41 = vld [vmem:[#allocation2] sm:$0x1] }
  0x19   :  { %875 = vmatprep.mubr.f32.mxu1 %v359_v38 }
  0x1a   :  { %820 = vmatmul.mubr.msk.f32.gmra.mrb[6].mxu0 %vm137_vm0, %v32_v20 }
  0x1b   :  { %822 = vmatprep.mubr.msk.f32.mxu0 %vm137_vm0, %v33_v22  ;;  %104 = vperm.xlu1 %949, %v1122_v23  }
  0x1c   :  { %109 = vperm.xlu0 %948, %v1134_v25  }
  0x1e   :  { %823 = vmatmul.mubr.msk.f32.gmra.mrb[8].mxu0 %vm137_vm0, %v34_v24 }
  0x1f   :  { %825 = vmatprep.mubr.msk.f32.mxu0 %vm137_vm0, %v35_v26  ;;  %114 = vperm.xlu1 %949, %v1142_v27  }
  0x20   :  { %119 = vperm.xlu0 %948, %v1154_v29  }
  0x22   :  { %826 = vmatmul.mubr.msk.f32.gmra.mrb[10].mxu0 %vm137_vm0, %v36_v28 }
  0x23   :  { %828 = vmatprep.mubr.msk.f32.mxu0 %vm137_vm0, %v37_v30  ;;  %124 = vperm.xlu1 %949, %v1162_v31  }
  0x24   :  { %129 = vperm.xlu0 %948, %v1174_v33  }
  0x26   :  { %829 = vmatmul.mubr.msk.f32.gmra.mrb[12].mxu0 %vm137_vm0, %v38_v32 }
  0x27   :  { %831 = vmatprep.mubr.msk.f32.mxu0 %vm137_vm0, %v39_v34  ;;  %134 = vperm.xlu1 %949, %v1182_v35  }
  0x28   :  { %951 = vset.pattern.permute.xlu0 %v990_v40 }
  0x29   :  { %595 = vperm.xlu0 %951, %v1042_v6  }
  0x2a   :  { %832 = vmatmul.mubr.msk.f32.gmra.mrb[14].mxu0 %vm137_vm0, %v40_v36 }
  0x2b   :  { %866 = vmatprep.mubr.f32.mxu0 %v353_v37  ;;  %950 = vset.pattern.permute.xlu1 %v989_v39 }
  0x2c   :  { %374 = vperm.xlu1 %950, %v1057_v9  }
  0x2d   :  { %611 = vperm.xlu0 %951, %v45_v13  }
  0x30   :  { %378 = vperm.xlu1 %950, %v1047_v7  }
  0x31   :  { %623 = vperm.xlu0 %951, %v1102_v19  }
  0x34   :  { %386 = vperm.xlu1 %950, %v45_v13  }
  0x35   :  { %635 = vperm.xlu0 %951, %v1134_v25  }
  0x38   :  { %952 = vset.pattern.permute.xlu1 %v990_v40 }
  0x39   :  { %599 = vperm.xlu1 %952, %v1057_v9   ;;  %958 = vset.pattern.permute.xlu0 %v989_v39 }
  0x3a   :  { %370 = vperm.xlu0 %958, %v1042_v6  }
  0x3d   :  { %603 = vperm.xlu1 %952, %v1047_v7  }
  0x3e   :  { %382 = vperm.xlu0 %958, %v1065_v11  }
  0x41   :  { %607 = vperm.xlu1 %952, %v1065_v11  }
  0x42   :  { %390 = vperm.xlu0 %958, %v1083_v15  }
  0x45   :  { %953 = vset.pattern.permute.xlu1 %v989_v39 }
  0x46   :  { %394 = vperm.xlu1 %953, %v1094_v17   ;;  %402 = vperm.xlu0 %958, %v1114_v21  }
  0x4a   :  { %398 = vperm.xlu1 %953, %v1102_v19   ;;  %414 = vperm.xlu0 %958, %v1142_v27  }
  0x4e   :  { %954 = vset.pattern.permute.xlu1 %v990_v40  ;;  %426 = vperm.xlu0 %958, %v1174_v33  }
  0x4f   :  { %615 = vperm.xlu1 %954, %v1083_v15  }
  0x52   :  { %961 = vset.pattern.permute.xlu0 %v990_v40 }
  0x53   :  { %619 = vperm.xlu1 %954, %v1094_v17   ;;  %647 = vperm.xlu0 %961, %v1162_v31  }
  0x57   :  { %955 = vset.pattern.permute.xlu1 %v989_v39  ;;  %963 = vset.pattern.permute.xlu0 %v988_v5 }
  0x58   :  { %406 = vperm.xlu1 %955, %v1122_v23   ;;  %714 = vperm.xlu0 %963, %v711_v41  }
  0x5c   :  { %410 = vperm.xlu1 %955, %v1134_v25  }
  0x60   :  { %956 = vset.pattern.permute.xlu1 %v990_v40 }
  0x61   :  { %627 = vperm.xlu1 %956, %v1114_v21  }
  0x65   :  { %631 = vperm.xlu1 %956, %v1122_v23  }
  0x69   :  { %957 = vset.pattern.permute.xlu1 %v989_v39 }
  0x6a   :  { %418 = vperm.xlu1 %957, %v1154_v29  }
  0x6e   :  { %422 = vperm.xlu1 %957, %v1162_v31  }
  0x72   :  { %959 = vset.pattern.permute.xlu1 %v990_v40 }
  0x73   :  { %639 = vperm.xlu1 %959, %v1142_v27  }
  0x77   :  { %643 = vperm.xlu1 %959, %v1154_v29  }
  0x7b   :  { %960 = vset.pattern.permute.xlu1 %v989_v39 }
  0x7c   :  { %430 = vperm.xlu1 %960, %v1182_v35  }
  0x80   :  { %962 = vset.pattern.permute.xlu1 %v990_v40 }
  0x81   :  { %651 = vperm.xlu1 %962, %v1174_v33  }
  0x84   :  { %v70_v42 = vpop.permute.xlu1 %69 }
  0x85   :  { %v60_v43 = vpop.permute.xlu0 %59  ;;  %655 = vperm.xlu1 %962, %v1182_v35  }
  0x89   :  { %v65_v45 = vpop.permute.xlu0 %64 }
  0x8e   :  { %v75_v44 = vpop.permute.xlu1 %74 }
  0x8f   :  { %v80_v47 = vpop.permute.xlu0 %79 }
  0x92   :  { %v85_v46 = vpop.permute.xlu1 %84 }
  0x93   :  { %v90_v56 = vpop.permute.xlu0 %89 }
  0x96   :  { %v95_v53 = vpop.permute.xlu1 %94 }
  0x97   :  { %v100_v5 = vpop.permute.xlu0 %99 }
  0x9a   :  { %v105_v2 = vpop.permute.xlu1 %104 }
  0x9b   :  { %v110_v17 = vpop.permute.xlu0 %109 }
  0x9e   :  { %v115_v14 = vpop.permute.xlu1 %114 }
  0x9f   :  { %v120_v30 = vpop.permute.xlu0 %119 }
  0xa2   :  { %v125_v27 = vpop.permute.xlu1 %124 }
  0xa6   :  { %v135_v40 = vpop.permute.xlu1 %134 }
  0xe1   :  { %v812_v48 = vpop.f32.mrb[0].mxu0 }
  0xe2   :  { %v264_v49 = vadd.f32 %v812_v48, %v65_v45  ;;  %v258_v50 = vpop.f32.mrb[1].mxu0 }
  0xe3   :  { %v259_v51 = vadd.f32 %v258_v50, %v60_v43  ;;  %v130_v43 = vpop.permute.xlu0 %129  ;;  %v354_v50 = vld [vmem:[%s1332_s2 + $0x8] sm:$0xff] }
  0xe4   :  { %v338_v52 = vmax.f32 %v264_v49, 0.0 }
  0xe5   :  { %v337_v54 = vmax.f32 %v259_v51, 0.0  ;;  %v815_v55 = vpop.f32.mrb[2].mxu0  ;;  %v360_v51 = vld [vmem:[%s1332_s2 + $0x38] sm:$0xff] }
  0xe6   :  { %v274_v57 = vadd.f32 %v815_v55, %v75_v44  ;;  %v268_v58 = vpop.f32.mrb[3].mxu0  ;;  %v362_v55 = vld [vmem:[%s1332_s2 + $0x48] sm:$0xff] }
  0xe7   :  { %v896_v59 = vpack.c.bf16 %v338_v52, %v337_v54  ;;  %v269_v60 = vadd.f32 %v268_v58, %v70_v42  ;;  %v355_v52 = vld [vmem:[%s1332_s2 + $0x10] sm:$0xff]  ;;  %v356_v54 = vld [vmem:[%s1332_s2 + $0x18] sm:$0xff]  ;;  %v358_v58 = vld [vmem:[%s1332_s2 + $0x28] sm:$0xff] }
  0xe8   :  { %v340_v61 = vmax.f32 %v274_v57, 0.0  ;;  %v363_v57 = vld [vmem:[%s1332_s2 + $0x50] sm:$0xff] }
  0xe9   :  { %v339_v62 = vmax.f32 %v269_v60, 0.0  ;;  %v818_v63 = vpop.f32.mrb[4].mxu0  ;;  %897 = vmatprep.subr.bf16.mxu0 %v896_v59  ;;  %928 = vmatprep.subr.bf16.mxu1 %v896_v59  ;;  %v365_v60 = vld [vmem:[%s1332_s2 + $0x60] sm:$0xff] }
  0xea   :  { %v284_v0 = vadd.f32 %v818_v63, %v85_v46  ;;  %v278_v1 = vpop.f32.mrb[5].mxu0  ;;  %899 = vmatpush3.bf16.msra.mxu0 %v896_v59  ;;  %936 = vmatpush3.bf16.msra.mxu1 %v896_v59  ;;  %v364_v59 = vld [vmem:[%s1332_s2 + $0x58] sm:$0xff] }
  0xeb   :  { %v900_v3 = vpack.c.bf16 %v340_v61, %v339_v62  ;;  %v279_v4 = vadd.f32 %v278_v1, %v80_v47  ;;  %v366_v61 = vld [vmem:[%s1332_s2 + $0x68] sm:$0xff]  ;;  %v367_v62 = vld [vmem:[%s1332_s2 + $0x70] sm:$0xff]  ;;  %v368_v63 = vld [vmem:[%s1332_s2 + $0x78] sm:$0xff] }
  0xec   :  { %v342_v6 = vmax.f32 %v284_v0, 0.0  ;;  %v375_v0 = vpop.permute.xlu1 %374 }
  0xed   :  { %v341_v7 = vmax.f32 %v279_v4, 0.0  ;;  %v821_v8 = vpop.f32.mrb[6].mxu0  ;;  %901 = vmatprep.subr.bf16.mxu0 %v900_v3  ;;  %929 = vmatprep.subr.bf16.mxu1 %v900_v3 }
  0xee   :  { %v294_v9 = vadd.f32 %v821_v8, %v95_v53  ;;  %v288_v10 = vpop.f32.mrb[7].mxu0  ;;  %903 = vmatpush3.bf16.msra.mxu0 %v900_v3  ;;  %937 = vmatpush3.bf16.msra.mxu1 %v900_v3  ;;  %v361_v53 = vld [vmem:[%s1332_s2 + $0x40] sm:$0xff] }
  0xef   :  { %v904_v11 = vpack.c.bf16 %v342_v6, %v341_v7  ;;  %v289_v12 = vadd.f32 %v288_v10, %v90_v56  ;;  %v357_v56 = vld [vmem:[%s1332_s2 + $0x20] sm:$0xff]  ;;  %v596_v10 = vpop.permute.xlu0 %595  ;;  %s991_s2 = smov [#allocation3]  }
  0xf0   :  { %v344_v13 = vmax.f32 %v294_v9, 0.0  ;;  %v379_v1 = vpop.permute.xlu1 %378  ;;  %s730_s9 = sshll.u32 %s991_s2, 4  ;;  %s731_s9 = int_to_ptr.vmem [resolvable:$true] %s730_s9 }
  0xf1   :  { %v343_v15 = vmax.f32 %v289_v12, 0.0  ;;  %v824_v16 = vpop.f32.mrb[8].mxu0  ;;  %905 = vmatprep.subr.bf16.mxu0 %v904_v11  ;;  %930 = vmatprep.subr.bf16.mxu1 %v904_v11  ;;  %s964_s1 = scalar_lea.vmem %s731_s9, 16  ;;  %s968_s10 = scalar_lea.vmem %s731_s9, 32 }
  0xf2   :  { %v304_v18 = vadd.f32 %v824_v16, %v105_v2  ;;  %v298_v19 = vpop.f32.mrb[9].mxu0  ;;  %907 = vmatpush3.bf16.msra.mxu0 %v904_v11  ;;  %938 = vmatpush3.bf16.msra.mxu1 %v904_v11  ;;  %p965_p0 = scmp.ne.s32.totalorder %s731_s9, %s964_s1  ;;  %p969_p1 = scmp.lt.s32.totalorder %s731_s9, %s731_s9 }
  0xf3   :  { %v908_v20 = vpack.c.bf16 %v344_v13, %v343_v15  ;;  %v299_v21 = vadd.f32 %v298_v19, %v100_v5  ;;  %v612_v12 = vpop.permute.xlu0 %611  ;;  %p970_p2 = scmp.lt.s32.totalorder %s968_s10, %s964_s1 }
  0xf4   :  { %v346_v22 = vmax.f32 %v304_v18, 0.0  ;;  %v387_v2 = vpop.permute.xlu1 %386 }
  0xf5   :  { %v345_v23 = vmax.f32 %v299_v21, 0.0  ;;  %v827_v24 = vpop.f32.mrb[10].mxu0  ;;  %909 = vmatprep.subr.bf16.mxu0 %v908_v20  ;;  %931 = vmatprep.subr.bf16.mxu1 %v908_v20  ;;  %p971_p3 = por %p970_p2, %p969_p1 }
  0xf6   :  { %v314_v25 = vadd.f32 %v827_v24, %v115_v14  ;;  %v308_v26 = vpop.f32.mrb[11].mxu0  ;;  %911 = vmatpush3.bf16.msra.mxu0 %v908_v20  ;;  %939 = vmatpush3.bf16.msra.mxu1 %v908_v20 }
  0xf7   :  { %v912_v28 = vpack.c.bf16 %v346_v22, %v345_v23  ;;  %v309_v29 = vadd.f32 %v308_v26, %v110_v17  ;;  %v1284_v14 = vpop.permute.xlu0 %623  ;;  %p972_p4 = pnand %p971_p3, %p965_p0 }
  0xf8   :  { %v348_v31 = vmax.f32 %v314_v25, 0.0  ;;  %v600_v3 = vpop.permute.xlu1 %599 }
  0xf9   :  { %v347_v32 = vmax.f32 %v309_v29, 0.0  ;;  %v830_v34 = vpop.f32.mrb[12].mxu0  ;;  %913 = vmatprep.subr.bf16.mxu0 %v912_v28  ;;  %932 = vmatprep.subr.bf16.mxu1 %v912_v28 }
  0xfa   :  { %v324_v33 = vadd.f32 %v830_v34, %v125_v27  ;;  %v318_v36 = vpop.f32.mrb[13].mxu0  ;;  %915 = vmatpush3.bf16.msra.mxu0 %v912_v28  ;;  %940 = vmatpush3.bf16.msra.mxu1 %v912_v28 }
  0xfb   :  { %v916_v37 = vpack.c.bf16 %v348_v31, %v347_v32  ;;  %v319_v38 = vadd.f32 %v318_v36, %v120_v30  ;;  %v1288_v16 = vpop.permute.xlu0 %635 }
  0xfc   :  { %v350_v39 = vmax.f32 %v324_v33, 0.0  ;;  %v604_v4 = vpop.permute.xlu1 %603 }
  0xfd   :  { %v349_v41 = vmax.f32 %v319_v38, 0.0  ;;  %v833_v42 = vpop.f32.mrb[14].mxu0  ;;  %917 = vmatprep.subr.bf16.mxu0 %v916_v37  ;;  %933 = vmatprep.subr.bf16.mxu1 %v916_v37 }
  0xfe   :  { %v334_v35 = vadd.f32 %v833_v42, %v135_v40  ;;  %v328_v44 = vpop.f32.mrb[15].mxu0  ;;  %919 = vmatpush3.bf16.msra.mxu0 %v916_v37  ;;  %941 = vmatpush3.bf16.msra.mxu1 %v916_v37 }
  0xff   :  { %v920_v45 = vpack.c.bf16 %v350_v39, %v349_v41  ;;  %v329_v46 = vadd.f32 %v328_v44, %v130_v43  ;;  %v371_v18 = vpop.permute.xlu0 %370 }
 0x100   :  { %v352_v47 = vmax.f32 %v334_v35, 0.0  ;;  %v608_v5 = vpop.permute.xlu1 %607 }
 0x101   :  { %v351_v48 = vmax.f32 %v329_v46, 0.0  ;;  %921 = vmatprep.subr.bf16.mxu0 %v920_v45  ;;  %934 = vmatprep.subr.bf16.mxu1 %v920_v45 }
 0x102   :  { %923 = vmatpush3.bf16.msra.mxu0 %v920_v45  ;;  %942 = vmatpush3.bf16.msra.mxu1 %v920_v45 }
 0x103   :  { %v924_v49 = vpack.c.bf16 %v352_v47, %v351_v48  ;;  %v383_v20 = vpop.permute.xlu0 %382 }
 0x104   :  { %v395_v6 = vpop.permute.xlu1 %394 }
 0x105   :  { %925 = vmatprep.subr.bf16.mxu0 %v924_v49  ;;  %935 = vmatprep.subr.bf16.mxu1 %v924_v49 }
 0x106   :  { %927 = vmatpush3.bf16.msra.mxu0 %v924_v49  ;;  %943 = vmatpush3.bf16.msra.mxu1 %v924_v49 }
 0x107   :  { %v391_v28 = vpop.permute.xlu0 %390 }
 0x108   :  { %v399_v7 = vpop.permute.xlu1 %398 }
 0x109   :  { %867 = vmatmul.mubr.f32.vlgmr.msra.gmra.mrb[16].mxu0 %v354_v50  ;;  %876 = vmatmul.mubr.f32.vlgmr.msra.gmra.mrb[0].mxu1 %v360_v51 }
 0x10a   :  { %869 = vmatprep.mubr.f32.mxu0 %v355_v52  ;;  %878 = vmatprep.mubr.f32.mxu1 %v361_v53 }
 0x10c   :  { %v616_v8 = vpop.permute.xlu1 %615 }
 0x10d   :  { %870 = vmatmul.mubr.f32.gmra.mrb[18].mxu0 %v356_v54  ;;  %879 = vmatmul.mubr.f32.gmra.mrb[2].mxu1 %v362_v55  ;;  %v403_v55 = vpop.permute.xlu0 %402 }
 0x10e   :  { %872 = vmatprep.mubr.f32.mxu0 %v357_v56  ;;  %881 = vmatprep.mubr.f32.mxu1 %v363_v57 }
 0x110   :  { %v620_v9 = vpop.permute.xlu1 %619 }
 0x111   :  { %873 = vmatmul.mubr.f32.gmra.mrb[20].mxu0 %v358_v58  ;;  %882 = vmatmul.mubr.f32.gmra.mrb[4].mxu1 %v364_v59 }
 0x112   :  { %884 = vmatprep.mubr.f32.mxu1 %v365_v60 }
 0x114   :  { %v407_v11 = vpop.permute.xlu1 %406 }
 0x115   :  { %885 = vmatmul.mubr.f32.gmra.mrb[6].mxu1 %v366_v61 }
 0x116   :  { %887 = vmatprep.mubr.f32.mxu1 %v367_v62 }
 0x118   :  { %v411_v13 = vpop.permute.xlu1 %410 }
 0x119   :  { %888 = vmatmul.mubr.f32.gmra.mrb[8].mxu1 %v368_v63 }
 0x11c   :  { %v1286_v15 = vpop.permute.xlu1 %627 }
 0x120   :  { %v1290_v17 = vpop.permute.xlu1 %631 }
 0x124   :  { %v1292_v19 = vpop.permute.xlu1 %418 }
 0x128   :  { %v1294_v21 = vpop.permute.xlu1 %422 }
 0x12c   :  { %v640_v42 = vpop.permute.xlu1 %639 }
 0x1dc   :  { %v868_v22 = vpop.f32.mrb[16].mxu0  ;;  %v877_v23 = vpop.f32.mrb[0].mxu1 }
 0x1dd   :  { %v505_v24 = vadd.f32 %v868_v22, %v375_v0  ;;  %v499_v25 = vpop.f32.mrb[17].mxu0  ;;  %v529_v26 = vpop.f32.mrb[1].mxu1  ;;  %v535_v47 = vadd.f32 %v877_v23, %v399_v7 }
 0x1de   :  { %v500_v27 = vadd.f32 %v499_v25, %v371_v18  ;;  %v530_v35 = vadd.f32 %v529_v26, %v395_v6  ;;  %v415_v23 = vpop.permute.xlu0 %414 }
 0x1df   :  { %v579_v29 = vmax.f32 %v505_v24, 0.0  ;;  %v585_v62 = vmax.f32 %v535_v47, 0.0 }
 0x1e0   :  { %v578_v30 = vmax.f32 %v500_v27, 0.0  ;;  %v871_v31 = vpop.f32.mrb[18].mxu0  ;;  %v880_v32 = vpop.f32.mrb[2].mxu1  ;;  %v584_v57 = vmax.f32 %v530_v35, 0.0 }
 0x1e1   :  { %v659_v34 = vmul.f32 %v600_v3, %v579_v29  ;;  %v515_v33 = vadd.f32 %v871_v31, %v383_v20  ;;  %v509_v36 = vpop.f32.mrb[19].mxu0  ;;  %v539_v37 = vpop.f32.mrb[3].mxu1  ;;  %v545_v3 = vadd.f32 %v880_v32, %v407_v11  ;;  %v665_v26 = vmul.f32 %v1284_v14, %v585_v62 }
 0x1e2   :  { %v658_v38 = vmul.f32 %v596_v10, %v578_v30  ;;  %v510_v39 = vadd.f32 %v509_v36, %v379_v1  ;;  %v540_v59 = vadd.f32 %v539_v37, %v403_v55  ;;  %v427_v36 = vpop.permute.xlu0 %426 }
 0x1e3   :  { %v675_v40 = vsel %vm137_vm0, %v659_v34, 0.0  ;;  %v581_v41 = vmax.f32 %v515_v33, 0.0  ;;  %v587_v27 = vmax.f32 %v545_v3, 0.0  ;;  %v687_v32 = vsel %vm137_vm0, %v665_v26, 0.0 }
 0x1e4   :  { %v674_v43 = vsel %vm137_vm0, %v658_v38, 0.0  ;;  %v580_v44 = vmax.f32 %v510_v39, 0.0  ;;  %v874_v45 = vpop.f32.mrb[20].mxu0  ;;  %v883_v46 = vpop.f32.mrb[4].mxu1 }
 0x1e5   :  { %v676_v48 = vadd.f32 %v675_v40, %v674_v43  ;;  %v525_v49 = vadd.f32 %v874_v45, %v391_v28  ;;  %v519_v50 = vpop.f32.mrb[21].mxu0  ;;  %v549_v51 = vpop.f32.mrb[5].mxu1  ;;  %v661_v52 = vmul.f32 %v608_v5, %v581_v41  ;;  %v555_v29 = vadd.f32 %v883_v46, %v415_v23 }
 0x1e6   :  { %v660_v53 = vmul.f32 %v604_v4, %v580_v44  ;;  %v520_v54 = vadd.f32 %v519_v50, %v387_v2  ;;  %v644_v5 = vpop.permute.xlu1 %643  ;;  %v664_v4 = vmul.f32 %v620_v9, %v584_v57  ;;  %v586_v2 = vmax.f32 %v540_v59, 0.0  ;;  %v648_v46 = vpop.permute.xlu0 %647 }
 0x1e7   :  { %v583_v56 = vmax.f32 %v525_v49, 0.0  ;;  %v679_v1 = vsel %vm137_vm0, %v661_v52, 0.0  ;;  %v550_v20 = vadd.f32 %v549_v51, %v411_v13  ;;  %v667_v34 = vmul.f32 %v1290_v17, %v587_v27 }
 0x1e8   :  { %v677_v58 = vsel %vm137_vm0, %v660_v53, 0.0  ;;  %v582_v60 = vmax.f32 %v520_v54, 0.0  ;;  %v886_v61 = vpop.f32.mrb[6].mxu1  ;;  %v589_v33 = vmax.f32 %v555_v29, 0.0 }
 0x1e9   :  { %v678_v63 = vadd.f32 %v677_v58, %v676_v48  ;;  %v559_v0 = vpop.f32.mrb[7].mxu1  ;;  %v663_v6 = vmul.f32 %v616_v8, %v583_v56  ;;  %v685_v8 = vsel %vm137_vm0, %v664_v4, 0.0  ;;  %v588_v9 = vmax.f32 %v550_v20, 0.0 }
 0x1ea   :  { %v662_v7 = vmul.f32 %v612_v12, %v582_v60  ;;  %v666_v12 = vmul.f32 %v1286_v15, %v586_v2  ;;  %v560_v30 = vadd.f32 %v559_v0, %v1292_v19  ;;  %v431_v13 = vpop.permute.xlu1 %430  ;;  %v565_v14 = vadd.f32 %v886_v61, %v1294_v21 }
 0x1eb   :  { %v680_v10 = vadd.f32 %v679_v1, %v678_v63  ;;  %v683_v28 = vsel %vm137_vm0, %v663_v6, 0.0  ;;  %v668_v39 = vmul.f32 %v1288_v16, %v588_v9  ;;  %v691_v19 = vsel %vm137_vm0, %v667_v34, 0.0 }
 0x1ec   :  { %v681_v18 = vsel %vm137_vm0, %v662_v7, 0.0  ;;  %v889_v22 = vpop.f32.mrb[8].mxu1  ;;  %v689_v38 = vsel %vm137_vm0, %v666_v12, 0.0  ;;  %v590_v40 = vmax.f32 %v560_v30, 0.0  ;;  %v669_v43 = vmul.f32 %v640_v42, %v589_v33 }
 0x1ed   :  { %v682_v24 = vadd.f32 %v681_v18, %v680_v10  ;;  %v569_v25 = vpop.f32.mrb[9].mxu1  ;;  %v591_v35 = vmax.f32 %v565_v14, 0.0  ;;  %v575_v44 = vadd.f32 %v889_v22, %v431_v13  ;;  %v693_v47 = vsel %vm137_vm0, %v668_v39, 0.0  ;;  %v715_v10 = vpop.permute.xlu0 %714 }
 0x1ee   :  { %v570_v15 = vadd.f32 %v569_v25, %v427_v36  ;;  %v652_v17 = vpop.permute.xlu1 %651  ;;  %v670_v21 = vmul.f32 %v644_v5, %v590_v40  ;;  %v695_v50 = vsel %vm137_vm0, %v669_v43, 0.0  ;;  %v717_v61 = vlaneseq }
 0x1ef   :  { %v684_v11 = vadd.f32 %v683_v28, %v682_v24  ;;  %v671_v51 = vmul.f32 %v648_v46, %v591_v35  ;;  %v593_v16 = vmax.f32 %v575_v44, 0.0 }
 0x1f0   :  { %v592_v48 = vmax.f32 %v570_v15, 0.0  ;;  %v697_v54 = vsel %vm137_vm0, %v670_v21, 0.0  ;;  %v718_v1 = vshrl.u32 %v717_v61, 7 }
 0x1f1   :  { %v686_v31 = vadd.f32 %v685_v8, %v684_v11  ;;  %v699_v56 = vsel %vm137_vm0, %v671_v51, 0.0 }
 0x1f2   :  { %v656_v53 = vpop.permute.xlu1 %655  ;;  %v672_v55 = vmul.f32 %v652_v17, %v592_v48  ;;  %v719_v7 = vsub.s32 0, %v718_v1 }
 0x1f3   :  { %v688_v37 = vadd.f32 %v687_v32, %v686_v31  ;;  %v673_v57 = vmul.f32 %v656_v53, %v593_v16 }
 0x1f4   :  { %v701_v59 = vsel %vm137_vm0, %v672_v55, 0.0  ;;  %v720_v2 = vrot.slane %v715_v10, %v719_v7 }
 0x1f5   :  { %v690_v41 = vadd.f32 %v689_v38, %v688_v37  ;;  %v703_v62 = vsel %vm137_vm0, %v673_v57, 0.0 }
 0x1f7   :  { %v692_v45 = vadd.f32 %v691_v19, %v690_v41 }
 0x1f9   :  { %v694_v49 = vadd.f32 %v693_v47, %v692_v45 }
 0x1fb   :  { %v696_v52 = vadd.f32 %v695_v50, %v694_v49 }
 0x1fd   :  { %v698_v42 = vadd.f32 %v697_v54, %v696_v52 }
 0x1ff   :  { %v700_v58 = vadd.f32 %v699_v56, %v698_v42 }
 0x201   :  { %v702_v60 = vadd.f32 %v701_v59, %v700_v58 }
 0x203   :  { %v704_v63 = vadd.f32 %v703_v62, %v702_v60 }
 0x205   :  { %v705_v0 = vrot.slane %v704_v63, 4 }
 0x207   :  { %v706_v3 = vadd.f32 %v705_v0, %v704_v63 }
 0x209   :  { %v707_v6 = vrot.slane %v706_v3, 2 }
 0x20b   :  { %v708_v5 = vadd.f32 %v707_v6, %v706_v3 }
 0x20d   :  { %v709_v4 = vrot.slane %v708_v5, 1 }
 0x20f   :  { %v710_v18 = vadd.f32 %v709_v4, %v708_v5 }
 0x211   :  { %v721_v20 = vadd.f32 %v720_v2, %v710_v18 }
 0x213   :  { %723 = vst.msk [vmem:[#allocation3] sm:$0x1] %vm722_vm2, %v721_v20 }
 0x214   :  { %975 = shalt.err (!%p972_p4)
}
 0x215   :  { %s976_s13 = scalar_lea.hbm %s1335_s5, 16 }
 0x216   :  { %p977_p5 = scmp.ne.s32.totalorder %s1335_s5, %s976_s13  ;;  %p980_p6 = scmp.lt.u32.totalorder %s976_s13, %s1335_s5 }
 0x218   :  { %p982_p7 = pnand %p980_p6, %p977_p5 }
 0x21a   :  { %985 = shalt.err (!%p982_p7)
}
 0x21b   :  { %733 = dma.vmem_to_hbm [thread:$0]  %s731_s9, 16, %s1335_s5, [#allocation4]  }
 0x21c   :  { %986 = dma.done.wait [#allocation4], 16  }
 0x21d   :  { %987 = vsyncadd [#allocation4], 4294967280 }
 0x21e   :  { %737 = vsyncpa [#allocation4], 1 }

</bundles_post_ra>
